<compile_context>
chip_gen: v6e
topology: v6e:2x2x1
jax: 0.10.0
libtpu: 0.0.40
codegen_flags: <defaults>
</compile_context>

<pallas_src>
import math
import functools

import numpy as np
import jax
import jax.numpy as jnp
from jax import lax
from jax.experimental import pallas as pl
from jax.experimental.pallas import tpu as pltpu  # noqa: F401  (scratch/params for real sizes)

# --- config (small, consistent with the module) ---
BATCH   = 2
BLOCK_T = 8      # sequence length T
N_EMBD  = 32     # C
N_HEAD  = 4
EPS     = 1e-5   # F.layer_norm eps used in the module
NEG_INF = -1e30  # finite large-negative mask value (NaN-safe under padding)


def _layernorm(x, w, b):
    # x: (R, C), w/b: (1, C); statistics in f32
    mu = jnp.mean(x, axis=-1, keepdims=True)
    var = jnp.mean((x - mu) ** 2, axis=-1, keepdims=True)
    return (x - mu) * lax.rsqrt(var + EPS) * w + b


def _gelu_exact(x):
    # PyTorch nn.GELU() default = exact (erf) gelu
    return 0.5 * x * (1.0 + lax.erf(x * (1.0 / math.sqrt(2.0))))


def block_kernel(x_ref, pvec_ref, wqkv_ref, bqkv_ref, wprojh_ref, wfc_ref,
                 wproj2_ref, out_ref, *, seq, n_head, approx_recip):
    BT, C = x_ref.shape               # folded rows = B*T, embedding = C
    hd = C // n_head
    mm_dt = wqkv_ref.dtype            # matmul-operand dtype (f32 or bf16)

    def mm(a, b):                     # a @ b, f32 accumulation on the MXU
        return jnp.dot(a.astype(mm_dt), b.astype(mm_dt),
                       preferred_element_type=jnp.float32)

    def mm_nt(a, b):                  # a @ b.T without an explicit transpose op
        return lax.dot_general(a.astype(mm_dt), b.astype(mm_dt),
                               (((1,), (1,)), ((), ())),
                               preferred_element_type=jnp.float32)

    # ---- unpack packed small-parameter slab (static slices, single DMA) ----
    ln1_w   = pvec_ref[0:1, 0:C]
    ln1_b   = pvec_ref[1:2, 0:C]
    ln2_w   = pvec_ref[2:3, 0:C]
    ln2_b   = pvec_ref[3:4, 0:C]
    b_proj  = pvec_ref[4:5, 0:C]
    b_proj2 = pvec_ref[5:6, 0:C]
    b_fc    = pvec_ref[6:7, 0:4 * C]

    x = x_ref[...]                    # (BT, C) f32

    # ---------------- attention branch ----------------
    h = _layernorm(x, ln1_w, ln1_b)

    # block-diagonal causal mask over the folded (B*T, B*T) score matrix:
    # same batch AND query position >= key position.
    row = lax.broadcasted_iota(jnp.int32, (BT, BT), 0)
    col = lax.broadcasted_iota(jnp.int32, (BT, BT), 1)
    if (seq & (seq - 1)) == 0:        # power-of-two T -> cheap shift
        sh = seq.bit_length() - 1
        rb, cb = row >> sh, col >> sh
    else:
        rb, cb = row // seq, col // seq
    mask = (rb == cb) & (row >= col)

    # per-head attention, accumulated straight through c_proj (K-split of
    # y @ Wproj). No lane-slicing of activations, no scratch stores.
    acc = jnp.zeros((BT, C), jnp.float32)
    for hidx in range(n_head):        # static loop over heads
        # 1/sqrt(hd) is pre-folded into the q weights/bias in the wrapper.
        qh = mm(h, wqkv_ref[0 * n_head + hidx]) + bqkv_ref[0 * n_head + hidx]
        kh = mm(h, wqkv_ref[1 * n_head + hidx]) + bqkv_ref[1 * n_head + hidx]
        vh = mm(h, wqkv_ref[2 * n_head + hidx]) + bqkv_ref[2 * n_head + hidx]

        att = mm_nt(qh, kh)                               # (BT, BT), f32
        att = jnp.where(mask, att, NEG_INF)
        att = att - jnp.max(att, axis=-1, keepdims=True)
        p = jnp.exp(att)
        p = p * pl.reciprocal(jnp.sum(p, axis=-1, keepdims=True),
                              approx=approx_recip)

        yh = mm(p, vh)                                    # (BT, hd)
        acc = acc + mm(yh, wprojh_ref[hidx])              # (BT, C)

    x1 = x + acc + b_proj             # residual 1 (attn/resid dropout p=0 in eval)

    # ---------------- MLP branch ----------------
    h2 = _layernorm(x1, ln2_w, ln2_b)
    f = mm(h2, wfc_ref[...]) + b_fc
    f = _gelu_exact(f)
    m = mm(f, wproj2_ref[...]) + b_proj2

    out_ref[...] = (x1 + m).astype(out_ref.dtype)   # residual 2 (dropout p=0)


def prepare_block_params(params, n_head=N_HEAD, mm_dtype=jnp.float32):
    """One-time packing: done once per set of weights, not per forward call."""
    C = params["ln1_w"].shape[0]
    hd = C // n_head
    pad = 4 * C                       # longest small param is b_fc (4C = 128 lanes)

    def _row(v, n):
        return jnp.zeros((pad,), jnp.float32).at[:n].set(v.astype(jnp.float32))

    # one packed (8, 4C) slab for all remaining small 1-D params -> one DMA
    pvec = jnp.stack([
        _row(params["ln1_w"], C),    _row(params["ln1_b"], C),
        _row(params["ln2_w"], C),    _row(params["ln2_b"], C),
        _row(params["b_proj"], C),   _row(params["b_proj2"], C),
        _row(params["b_fc"], 4 * C), jnp.zeros((pad,), jnp.float32),
    ])

    scale = 1.0 / math.sqrt(hd)
    # (C, 3C) -> (3, n_head, C, hd); fold the attention scale into the q slab.
    w_qkv = params["w_attn"].astype(jnp.float32).reshape(C, 3, n_head, hd)
    w_qkv = jnp.transpose(w_qkv, (1, 2, 0, 3))
    w_qkv = w_qkv.at[0].multiply(scale).reshape(3 * n_head, C, hd)

    b_qkv = params["b_attn"].astype(jnp.float32).reshape(3, n_head, hd)
    b_qkv = b_qkv.at[0].multiply(scale).reshape(3 * n_head, 1, hd)

    # c_proj split along its K (row) axis per head -> sublane-aligned slabs.
    w_proj_h = params["w_proj"].astype(jnp.float32).reshape(n_head, hd, C)

    return {
        "pvec":     pvec,                              # small params stay f32
        "w_qkv":    w_qkv.astype(mm_dtype),
        "b_qkv":    b_qkv,                             # biases stay f32
        "w_proj_h": w_proj_h.astype(mm_dtype),
        "w_fc":     params["w_fc"].astype(mm_dtype),
        "w_proj2":  params["w_proj2"].astype(mm_dtype),
    }


def block_forward(x, prep, n_head=N_HEAD, approx_recip=False):
    B, T, C = x.shape
    x2d = x.reshape(B * T, C)         # fold batch into rows (free in XLA)
    out2d = pl.pallas_call(
        functools.partial(block_kernel, seq=T, n_head=n_head,
                          approx_recip=approx_recip),
        out_shape=jax.ShapeDtypeStruct((B * T, C), x.dtype),
    )(x2d, prep["pvec"], prep["w_qkv"], prep["b_qkv"],
      prep["w_proj_h"], prep["w_fc"], prep["w_proj2"])
    return out2d.reshape(B, T, C)


# ---------------- pure-JAX reference for validation ----------------
def ref_block(x, p, n_head=N_HEAD):
    def ln(z, w, b):
        mu = z.mean(-1, keepdims=True)
        var = ((z - mu) ** 2).mean(-1, keepdims=True)
        return (z - mu) / jnp.sqrt(var + EPS) * w + b

    B, T, C = x.shape
    hd = C // n_head
    h = ln(x, p["ln1_w"], p["ln1_b"])
    qkv = h @ p["w_attn"] + p["b_attn"]
    q, k, v = jnp.split(qkv, 3, axis=-1)
    q = q.reshape(B, T, n_head, hd).transpose(0, 2, 1, 3)
    k = k.reshape(B, T, n_head, hd).transpose(0, 2, 1, 3)
    v = v.reshape(B, T, n_head, hd).transpose(0, 2, 1, 3)
    att = (q @ jnp.swapaxes(k, -1, -2)) / math.sqrt(hd)
    mask = jnp.tril(jnp.ones((T, T), bool))
    att = jnp.where(mask, att, -jnp.inf)
    att = jax.nn.softmax(att, axis=-1)
    y = (att @ v).transpose(0, 2, 1, 3).reshape(B, T, C)
    y = y @ p["w_proj"] + p["b_proj"]
    x1 = x + y
    h2 = ln(x1, p["ln2_w"], p["ln2_b"])
    f = jax.nn.gelu(h2 @ p["w_fc"] + p["b_fc"], approximate=False)
    return x1 + f @ p["w_proj2"] + p["b_proj2"]


def init_params(key, C):
    ks = jax.random.split(key, 12)
    s = 0.02
    return {
        "ln1_w":   1.0 + s * jax.random.normal(ks[0], (C,), jnp.float32),
        "ln1_b":   s * jax.random.normal(ks[1], (C,), jnp.float32),
        "w_attn":  s * jax.random.normal(ks[2], (C, 3 * C), jnp.float32),
        "b_attn":  s * jax.random.normal(ks[3], (3 * C,), jnp.float32),
        "w_proj":  s * jax.random.normal(ks[4], (C, C), jnp.float32),
        "b_proj":  s * jax.random.normal(ks[5], (C,), jnp.float32),
        "ln2_w":   1.0 + s * jax.random.normal(ks[6], (C,), jnp.float32),
        "ln2_b":   s * jax.random.normal(ks[7], (C,), jnp.float32),
        "w_fc":    s * jax.random.normal(ks[8], (C, 4 * C), jnp.float32),
        "b_fc":    s * jax.random.normal(ks[9], (4 * C,), jnp.float32),
        "w_proj2": s * jax.random.normal(ks[10], (4 * C, C), jnp.float32),
        "b_proj2": s * jax.random.normal(ks[11], (C,), jnp.float32),
    }


if __name__ == "__main__":
    key = jax.random.PRNGKey(0)
    kx, kp = jax.random.split(key)
    x = jax.random.normal(kx, (BATCH, BLOCK_T, N_EMBD), jnp.float32)
    params = init_params(kp, N_EMBD)

    ref = jax.block_until_ready(ref_block(x, params))

    # precise path: f32 matmul operands + exact reciprocal (matches PyTorch f32)
    prep_f32 = prepare_block_params(params, mm_dtype=jnp.float32)
    out = jax.block_until_ready(block_forward(x, prep_f32, approx_recip=False))
    assert out.shape == x.shape and out.dtype == x.dtype
    np.testing.assert_allclose(np.asarray(out), np.asarray(ref), rtol=1e-4, atol=1e-4)

    # fast path: bf16 matmul operands (bf16-native MXUs on v5e/v6e/v7x) +
    # EUP approximate reciprocal; element-wise math stays f32. Looser tolerance
    # per review note (bf16 operands cannot meet 1e-4).
    prep_bf16 = prepare_block_params(params, mm_dtype=jnp.bfloat16)
    out_fast = jax.block_until_ready(block_forward(x, prep_bf16, approx_recip=True))
    assert out_fast.shape == x.shape and out_fast.dtype == x.dtype
    np.testing.assert_allclose(np.asarray(out_fast), np.asarray(ref), rtol=2e-2, atol=2e-2)

    print("KERNEL_OK")
</pallas_src>

<mosaic_0001>
module attributes {stable_mosaic.version = 11 : i64} {
  func.func @block_kernel(%arg0: memref<16x32xf32, #tpu.memory_space<vmem>>, %arg1: memref<8x128xf32, #tpu.memory_space<vmem>>, %arg2: memref<12x32x8xf32, #tpu.memory_space<vmem>>, %arg3: memref<12x1x8xf32, #tpu.memory_space<vmem>>, %arg4: memref<4x8x32xf32, #tpu.memory_space<vmem>>, %arg5: memref<32x128xf32, #tpu.memory_space<vmem>>, %arg6: memref<128x32xf32, #tpu.memory_space<vmem>>, %arg7: memref<16x32xf32, #tpu.memory_space<vmem>>) attributes {dimension_semantics = [], scalar_prefetch = 0 : i64, scratch_operands = 0 : i64, tpu.core_type = #tpu.core_type<tc>} {
    %c0 = arith.constant 0 : index
    %c0_0 = arith.constant 0 : index
    %0 = vector.load %arg1[%c0, %c0_0] : memref<8x128xf32, #tpu.memory_space<vmem>>, vector<1x32xf32>
    %c1 = arith.constant 1 : index
    %c0_1 = arith.constant 0 : index
    %1 = vector.load %arg1[%c1, %c0_1] : memref<8x128xf32, #tpu.memory_space<vmem>>, vector<1x32xf32>
    %c2 = arith.constant 2 : index
    %c0_2 = arith.constant 0 : index
    %2 = vector.load %arg1[%c2, %c0_2] : memref<8x128xf32, #tpu.memory_space<vmem>>, vector<1x32xf32>
    %c3 = arith.constant 3 : index
    %c0_3 = arith.constant 0 : index
    %3 = vector.load %arg1[%c3, %c0_3] : memref<8x128xf32, #tpu.memory_space<vmem>>, vector<1x32xf32>
    %c4 = arith.constant 4 : index
    %c0_4 = arith.constant 0 : index
    %4 = vector.load %arg1[%c4, %c0_4] : memref<8x128xf32, #tpu.memory_space<vmem>>, vector<1x32xf32>
    %c5 = arith.constant 5 : index
    %c0_5 = arith.constant 0 : index
    %5 = vector.load %arg1[%c5, %c0_5] : memref<8x128xf32, #tpu.memory_space<vmem>>, vector<1x32xf32>
    %c6 = arith.constant 6 : index
    %c0_6 = arith.constant 0 : index
    %6 = vector.load %arg1[%c6, %c0_6] : memref<8x128xf32, #tpu.memory_space<vmem>>, vector<1x128xf32>
    %c0_7 = arith.constant 0 : index
    %c0_8 = arith.constant 0 : index
    %7 = vector.load %arg0[%c0_7, %c0_8] : memref<16x32xf32, #tpu.memory_space<vmem>>, vector<16x32xf32>
    %cst = arith.constant dense<0.000000e+00> : vector<16xf32>
    %8 = vector.multi_reduction <add>, %7, %cst [1] : vector<16x32xf32> to vector<16xf32>
    %9 = vector.shape_cast %8 : vector<16xf32> to vector<16x1xf32>
    %cst_9 = arith.constant 3.200000e+01 : f32
    %10 = vector.broadcast %cst_9 : f32 to vector<16x1xf32>
    %11 = arith.divf %9, %10 : vector<16x1xf32>
    %12 = vector.broadcast %11 : vector<16x1xf32> to vector<16x32xf32>
    %13 = arith.subf %7, %12 : vector<16x32xf32>
    %14 = arith.mulf %13, %13 : vector<16x32xf32>
    %cst_10 = arith.constant dense<0.000000e+00> : vector<16xf32>
    %15 = vector.multi_reduction <add>, %14, %cst_10 [1] : vector<16x32xf32> to vector<16xf32>
    %16 = vector.shape_cast %15 : vector<16xf32> to vector<16x1xf32>
    %cst_11 = arith.constant 3.200000e+01 : f32
    %17 = vector.broadcast %cst_11 : f32 to vector<16x1xf32>
    %18 = arith.divf %16, %17 : vector<16x1xf32>
    %19 = vector.broadcast %11 : vector<16x1xf32> to vector<16x32xf32>
    %20 = arith.subf %7, %19 : vector<16x32xf32>
    %cst_12 = arith.constant 9.99999974E-6 : f32
    %21 = vector.broadcast %cst_12 : f32 to vector<16x1xf32>
    %22 = arith.addf %18, %21 : vector<16x1xf32>
    %23 = math.rsqrt %22 : vector<16x1xf32>
    %24 = vector.broadcast %23 : vector<16x1xf32> to vector<16x32xf32>
    %25 = arith.mulf %20, %24 : vector<16x32xf32>
    %26 = vector.broadcast %0 : vector<1x32xf32> to vector<16x32xf32>
    %27 = arith.mulf %25, %26 : vector<16x32xf32>
    %28 = vector.broadcast %1 : vector<1x32xf32> to vector<16x32xf32>
    %29 = arith.addf %27, %28 : vector<16x32xf32>
    %30 = tpu.iota {dimensions = array<i32: 0>} : vector<16x16xi32>
    %31 = tpu.iota {dimensions = array<i32: 1>} : vector<16x16xi32>
    %c3_i32 = arith.constant 3 : i32
    %32 = vector.broadcast %c3_i32 : i32 to vector<16x16xi32>
    %33 = arith.shrsi %30, %32 : vector<16x16xi32>
    %c3_i32_13 = arith.constant 3 : i32
    %34 = vector.broadcast %c3_i32_13 : i32 to vector<16x16xi32>
    %35 = arith.shrsi %31, %34 : vector<16x16xi32>
    %36 = arith.cmpi eq, %33, %35 : vector<16x16xi32>
    %37 = arith.cmpi sge, %30, %31 : vector<16x16xi32>
    %38 = arith.andi %36, %37 : vector<16x16xi1>
    %cst_14 = arith.constant 0.000000e+00 : f32
    %39 = vector.broadcast %cst_14 : f32 to vector<16x32xf32>
    %c0_15 = arith.constant 0 : index
    %c0_16 = arith.constant 0 : index
    %c0_17 = arith.constant 0 : index
    %40 = vector.load %arg2[%c0_15, %c0_16, %c0_17] : memref<12x32x8xf32, #tpu.memory_space<vmem>>, vector<1x32x8xf32>
    %41 = vector.shape_cast %40 : vector<1x32x8xf32> to vector<32x8xf32>
    %cst_18 = arith.constant dense<0.000000e+00> : vector<16x8xf32>
    %42 = tpu.matmul %29, %41, %cst_18 {dimension_numbers = #tpu.dot_dimension_numbers<[1], [0], [0], [1], [0, 0, 1, 1], [], []>} : vector<16x32xf32>, vector<32x8xf32>, vector<16x8xf32> -> vector<16x8xf32>
    %c0_19 = arith.constant 0 : index
    %c0_20 = arith.constant 0 : index
    %c0_21 = arith.constant 0 : index
    %43 = vector.load %arg3[%c0_19, %c0_20, %c0_21] : memref<12x1x8xf32, #tpu.memory_space<vmem>>, vector<1x1x8xf32>
    %44 = vector.shape_cast %43 : vector<1x1x8xf32> to vector<1x8xf32>
    %45 = vector.broadcast %44 : vector<1x8xf32> to vector<16x8xf32>
    %46 = arith.addf %42, %45 : vector<16x8xf32>
    %c4_22 = arith.constant 4 : index
    %c0_23 = arith.constant 0 : index
    %c0_24 = arith.constant 0 : index
    %47 = vector.load %arg2[%c4_22, %c0_23, %c0_24] : memref<12x32x8xf32, #tpu.memory_space<vmem>>, vector<1x32x8xf32>
    %48 = vector.shape_cast %47 : vector<1x32x8xf32> to vector<32x8xf32>
    %cst_25 = arith.constant dense<0.000000e+00> : vector<16x8xf32>
    %49 = tpu.matmul %29, %48, %cst_25 {dimension_numbers = #tpu.dot_dimension_numbers<[1], [0], [0], [1], [0, 0, 1, 1], [], []>} : vector<16x32xf32>, vector<32x8xf32>, vector<16x8xf32> -> vector<16x8xf32>
    %c4_26 = arith.constant 4 : index
    %c0_27 = arith.constant 0 : index
    %c0_28 = arith.constant 0 : index
    %50 = vector.load %arg3[%c4_26, %c0_27, %c0_28] : memref<12x1x8xf32, #tpu.memory_space<vmem>>, vector<1x1x8xf32>
    %51 = vector.shape_cast %50 : vector<1x1x8xf32> to vector<1x8xf32>
    %52 = vector.broadcast %51 : vector<1x8xf32> to vector<16x8xf32>
    %53 = arith.addf %49, %52 : vector<16x8xf32>
    %c8 = arith.constant 8 : index
    %c0_29 = arith.constant 0 : index
    %c0_30 = arith.constant 0 : index
    %54 = vector.load %arg2[%c8, %c0_29, %c0_30] : memref<12x32x8xf32, #tpu.memory_space<vmem>>, vector<1x32x8xf32>
    %55 = vector.shape_cast %54 : vector<1x32x8xf32> to vector<32x8xf32>
    %cst_31 = arith.constant dense<0.000000e+00> : vector<16x8xf32>
    %56 = tpu.matmul %29, %55, %cst_31 {dimension_numbers = #tpu.dot_dimension_numbers<[1], [0], [0], [1], [0, 0, 1, 1], [], []>} : vector<16x32xf32>, vector<32x8xf32>, vector<16x8xf32> -> vector<16x8xf32>
    %c8_32 = arith.constant 8 : index
    %c0_33 = arith.constant 0 : index
    %c0_34 = arith.constant 0 : index
    %57 = vector.load %arg3[%c8_32, %c0_33, %c0_34] : memref<12x1x8xf32, #tpu.memory_space<vmem>>, vector<1x1x8xf32>
    %58 = vector.shape_cast %57 : vector<1x1x8xf32> to vector<1x8xf32>
    %59 = vector.broadcast %58 : vector<1x8xf32> to vector<16x8xf32>
    %60 = arith.addf %56, %59 : vector<16x8xf32>
    %cst_35 = arith.constant dense<0.000000e+00> : vector<16x16xf32>
    %61 = tpu.matmul %46, %53, %cst_35 {dimension_numbers = #tpu.dot_dimension_numbers<[1], [1], [0], [0], [0, 0, 1, 0], [], []>} : vector<16x8xf32>, vector<16x8xf32>, vector<16x16xf32> -> vector<16x16xf32>
    %cst_36 = arith.constant -1.000000e+30 : f32
    %62 = vector.broadcast %cst_36 : f32 to vector<16x16xf32>
    %63 = arith.select %38, %61, %62 : vector<16x16xi1>, vector<16x16xf32>
    %cst_37 = arith.constant dense<0xFF800000> : vector<16xf32>
    %64 = vector.multi_reduction <maximumf>, %63, %cst_37 [1] : vector<16x16xf32> to vector<16xf32>
    %65 = vector.shape_cast %64 : vector<16xf32> to vector<16x1xf32>
    %66 = vector.broadcast %65 : vector<16x1xf32> to vector<16x16xf32>
    %67 = arith.subf %63, %66 : vector<16x16xf32>
    %68 = math.exp %67 : vector<16x16xf32>
    %cst_38 = arith.constant dense<0.000000e+00> : vector<16xf32>
    %69 = vector.multi_reduction <add>, %68, %cst_38 [1] : vector<16x16xf32> to vector<16xf32>
    %70 = vector.shape_cast %69 : vector<16xf32> to vector<16x1xf32>
    %71 = tpu.reciprocal %70 : vector<16x1xf32> -> vector<16x1xf32>
    %72 = vector.broadcast %71 : vector<16x1xf32> to vector<16x16xf32>
    %73 = arith.mulf %68, %72 : vector<16x16xf32>
    %cst_39 = arith.constant dense<0.000000e+00> : vector<16x8xf32>
    %74 = tpu.matmul %73, %60, %cst_39 {dimension_numbers = #tpu.dot_dimension_numbers<[1], [0], [0], [1], [0, 0, 1, 1], [], []>} : vector<16x16xf32>, vector<16x8xf32>, vector<16x8xf32> -> vector<16x8xf32>
    %c0_40 = arith.constant 0 : index
    %c0_41 = arith.constant 0 : index
    %c0_42 = arith.constant 0 : index
    %75 = vector.load %arg4[%c0_40, %c0_41, %c0_42] : memref<4x8x32xf32, #tpu.memory_space<vmem>>, vector<1x8x32xf32>
    %76 = vector.shape_cast %75 : vector<1x8x32xf32> to vector<8x32xf32>
    %cst_43 = arith.constant dense<0.000000e+00> : vector<16x32xf32>
    %77 = tpu.matmul %74, %76, %cst_43 {dimension_numbers = #tpu.dot_dimension_numbers<[1], [0], [0], [1], [0, 0, 1, 1], [], []>} : vector<16x8xf32>, vector<8x32xf32>, vector<16x32xf32> -> vector<16x32xf32>
    %78 = arith.addf %39, %77 : vector<16x32xf32>
    %c1_44 = arith.constant 1 : index
    %c0_45 = arith.constant 0 : index
    %c0_46 = arith.constant 0 : index
    %79 = vector.load %arg2[%c1_44, %c0_45, %c0_46] : memref<12x32x8xf32, #tpu.memory_space<vmem>>, vector<1x32x8xf32>
    %80 = vector.shape_cast %79 : vector<1x32x8xf32> to vector<32x8xf32>
    %cst_47 = arith.constant dense<0.000000e+00> : vector<16x8xf32>
    %81 = tpu.matmul %29, %80, %cst_47 {dimension_numbers = #tpu.dot_dimension_numbers<[1], [0], [0], [1], [0, 0, 1, 1], [], []>} : vector<16x32xf32>, vector<32x8xf32>, vector<16x8xf32> -> vector<16x8xf32>
    %c1_48 = arith.constant 1 : index
    %c0_49 = arith.constant 0 : index
    %c0_50 = arith.constant 0 : index
    %82 = vector.load %arg3[%c1_48, %c0_49, %c0_50] : memref<12x1x8xf32, #tpu.memory_space<vmem>>, vector<1x1x8xf32>
    %83 = vector.shape_cast %82 : vector<1x1x8xf32> to vector<1x8xf32>
    %84 = vector.broadcast %83 : vector<1x8xf32> to vector<16x8xf32>
    %85 = arith.addf %81, %84 : vector<16x8xf32>
    %c5_51 = arith.constant 5 : index
    %c0_52 = arith.constant 0 : index
    %c0_53 = arith.constant 0 : index
    %86 = vector.load %arg2[%c5_51, %c0_52, %c0_53] : memref<12x32x8xf32, #tpu.memory_space<vmem>>, vector<1x32x8xf32>
    %87 = vector.shape_cast %86 : vector<1x32x8xf32> to vector<32x8xf32>
    %cst_54 = arith.constant dense<0.000000e+00> : vector<16x8xf32>
    %88 = tpu.matmul %29, %87, %cst_54 {dimension_numbers = #tpu.dot_dimension_numbers<[1], [0], [0], [1], [0, 0, 1, 1], [], []>} : vector<16x32xf32>, vector<32x8xf32>, vector<16x8xf32> -> vector<16x8xf32>
    %c5_55 = arith.constant 5 : index
    %c0_56 = arith.constant 0 : index
    %c0_57 = arith.constant 0 : index
    %89 = vector.load %arg3[%c5_55, %c0_56, %c0_57] : memref<12x1x8xf32, #tpu.memory_space<vmem>>, vector<1x1x8xf32>
    %90 = vector.shape_cast %89 : vector<1x1x8xf32> to vector<1x8xf32>
    %91 = vector.broadcast %90 : vector<1x8xf32> to vector<16x8xf32>
    %92 = arith.addf %88, %91 : vector<16x8xf32>
    %c9 = arith.constant 9 : index
    %c0_58 = arith.constant 0 : index
    %c0_59 = arith.constant 0 : index
    %93 = vector.load %arg2[%c9, %c0_58, %c0_59] : memref<12x32x8xf32, #tpu.memory_space<vmem>>, vector<1x32x8xf32>
    %94 = vector.shape_cast %93 : vector<1x32x8xf32> to vector<32x8xf32>
    %cst_60 = arith.constant dense<0.000000e+00> : vector<16x8xf32>
    %95 = tpu.matmul %29, %94, %cst_60 {dimension_numbers = #tpu.dot_dimension_numbers<[1], [0], [0], [1], [0, 0, 1, 1], [], []>} : vector<16x32xf32>, vector<32x8xf32>, vector<16x8xf32> -> vector<16x8xf32>
    %c9_61 = arith.constant 9 : index
    %c0_62 = arith.constant 0 : index
    %c0_63 = arith.constant 0 : index
    %96 = vector.load %arg3[%c9_61, %c0_62, %c0_63] : memref<12x1x8xf32, #tpu.memory_space<vmem>>, vector<1x1x8xf32>
    %97 = vector.shape_cast %96 : vector<1x1x8xf32> to vector<1x8xf32>
    %98 = vector.broadcast %97 : vector<1x8xf32> to vector<16x8xf32>
    %99 = arith.addf %95, %98 : vector<16x8xf32>
    %cst_64 = arith.constant dense<0.000000e+00> : vector<16x16xf32>
    %100 = tpu.matmul %85, %92, %cst_64 {dimension_numbers = #tpu.dot_dimension_numbers<[1], [1], [0], [0], [0, 0, 1, 0], [], []>} : vector<16x8xf32>, vector<16x8xf32>, vector<16x16xf32> -> vector<16x16xf32>
    %cst_65 = arith.constant -1.000000e+30 : f32
    %101 = vector.broadcast %cst_65 : f32 to vector<16x16xf32>
    %102 = arith.select %38, %100, %101 : vector<16x16xi1>, vector<16x16xf32>
    %cst_66 = arith.constant dense<0xFF800000> : vector<16xf32>
    %103 = vector.multi_reduction <maximumf>, %102, %cst_66 [1] : vector<16x16xf32> to vector<16xf32>
    %104 = vector.shape_cast %103 : vector<16xf32> to vector<16x1xf32>
    %105 = vector.broadcast %104 : vector<16x1xf32> to vector<16x16xf32>
    %106 = arith.subf %102, %105 : vector<16x16xf32>
    %107 = math.exp %106 : vector<16x16xf32>
    %cst_67 = arith.constant dense<0.000000e+00> : vector<16xf32>
    %108 = vector.multi_reduction <add>, %107, %cst_67 [1] : vector<16x16xf32> to vector<16xf32>
    %109 = vector.shape_cast %108 : vector<16xf32> to vector<16x1xf32>
    %110 = tpu.reciprocal %109 : vector<16x1xf32> -> vector<16x1xf32>
    %111 = vector.broadcast %110 : vector<16x1xf32> to vector<16x16xf32>
    %112 = arith.mulf %107, %111 : vector<16x16xf32>
    %cst_68 = arith.constant dense<0.000000e+00> : vector<16x8xf32>
    %113 = tpu.matmul %112, %99, %cst_68 {dimension_numbers = #tpu.dot_dimension_numbers<[1], [0], [0], [1], [0, 0, 1, 1], [], []>} : vector<16x16xf32>, vector<16x8xf32>, vector<16x8xf32> -> vector<16x8xf32>
    %c1_69 = arith.constant 1 : index
    %c0_70 = arith.constant 0 : index
    %c0_71 = arith.constant 0 : index
    %114 = vector.load %arg4[%c1_69, %c0_70, %c0_71] : memref<4x8x32xf32, #tpu.memory_space<vmem>>, vector<1x8x32xf32>
    %115 = vector.shape_cast %114 : vector<1x8x32xf32> to vector<8x32xf32>
    %cst_72 = arith.constant dense<0.000000e+00> : vector<16x32xf32>
    %116 = tpu.matmul %113, %115, %cst_72 {dimension_numbers = #tpu.dot_dimension_numbers<[1], [0], [0], [1], [0, 0, 1, 1], [], []>} : vector<16x8xf32>, vector<8x32xf32>, vector<16x32xf32> -> vector<16x32xf32>
    %117 = arith.addf %78, %116 : vector<16x32xf32>
    %c2_73 = arith.constant 2 : index
    %c0_74 = arith.constant 0 : index
    %c0_75 = arith.constant 0 : index
    %118 = vector.load %arg2[%c2_73, %c0_74, %c0_75] : memref<12x32x8xf32, #tpu.memory_space<vmem>>, vector<1x32x8xf32>
    %119 = vector.shape_cast %118 : vector<1x32x8xf32> to vector<32x8xf32>
    %cst_76 = arith.constant dense<0.000000e+00> : vector<16x8xf32>
    %120 = tpu.matmul %29, %119, %cst_76 {dimension_numbers = #tpu.dot_dimension_numbers<[1], [0], [0], [1], [0, 0, 1, 1], [], []>} : vector<16x32xf32>, vector<32x8xf32>, vector<16x8xf32> -> vector<16x8xf32>
    %c2_77 = arith.constant 2 : index
    %c0_78 = arith.constant 0 : index
    %c0_79 = arith.constant 0 : index
    %121 = vector.load %arg3[%c2_77, %c0_78, %c0_79] : memref<12x1x8xf32, #tpu.memory_space<vmem>>, vector<1x1x8xf32>
    %122 = vector.shape_cast %121 : vector<1x1x8xf32> to vector<1x8xf32>
    %123 = vector.broadcast %122 : vector<1x8xf32> to vector<16x8xf32>
    %124 = arith.addf %120, %123 : vector<16x8xf32>
    %c6_80 = arith.constant 6 : index
    %c0_81 = arith.constant 0 : index
    %c0_82 = arith.constant 0 : index
    %125 = vector.load %arg2[%c6_80, %c0_81, %c0_82] : memref<12x32x8xf32, #tpu.memory_space<vmem>>, vector<1x32x8xf32>
    %126 = vector.shape_cast %125 : vector<1x32x8xf32> to vector<32x8xf32>
    %cst_83 = arith.constant dense<0.000000e+00> : vector<16x8xf32>
    %127 = tpu.matmul %29, %126, %cst_83 {dimension_numbers = #tpu.dot_dimension_numbers<[1], [0], [0], [1], [0, 0, 1, 1], [], []>} : vector<16x32xf32>, vector<32x8xf32>, vector<16x8xf32> -> vector<16x8xf32>
    %c6_84 = arith.constant 6 : index
    %c0_85 = arith.constant 0 : index
    %c0_86 = arith.constant 0 : index
    %128 = vector.load %arg3[%c6_84, %c0_85, %c0_86] : memref<12x1x8xf32, #tpu.memory_space<vmem>>, vector<1x1x8xf32>
    %129 = vector.shape_cast %128 : vector<1x1x8xf32> to vector<1x8xf32>
    %130 = vector.broadcast %129 : vector<1x8xf32> to vector<16x8xf32>
    %131 = arith.addf %127, %130 : vector<16x8xf32>
    %c10 = arith.constant 10 : index
    %c0_87 = arith.constant 0 : index
    %c0_88 = arith.constant 0 : index
    %132 = vector.load %arg2[%c10, %c0_87, %c0_88] : memref<12x32x8xf32, #tpu.memory_space<vmem>>, vector<1x32x8xf32>
    %133 = vector.shape_cast %132 : vector<1x32x8xf32> to vector<32x8xf32>
    %cst_89 = arith.constant dense<0.000000e+00> : vector<16x8xf32>
    %134 = tpu.matmul %29, %133, %cst_89 {dimension_numbers = #tpu.dot_dimension_numbers<[1], [0], [0], [1], [0, 0, 1, 1], [], []>} : vector<16x32xf32>, vector<32x8xf32>, vector<16x8xf32> -> vector<16x8xf32>
    %c10_90 = arith.constant 10 : index
    %c0_91 = arith.constant 0 : index
    %c0_92 = arith.constant 0 : index
    %135 = vector.load %arg3[%c10_90, %c0_91, %c0_92] : memref<12x1x8xf32, #tpu.memory_space<vmem>>, vector<1x1x8xf32>
    %136 = vector.shape_cast %135 : vector<1x1x8xf32> to vector<1x8xf32>
    %137 = vector.broadcast %136 : vector<1x8xf32> to vector<16x8xf32>
    %138 = arith.addf %134, %137 : vector<16x8xf32>
    %cst_93 = arith.constant dense<0.000000e+00> : vector<16x16xf32>
    %139 = tpu.matmul %124, %131, %cst_93 {dimension_numbers = #tpu.dot_dimension_numbers<[1], [1], [0], [0], [0, 0, 1, 0], [], []>} : vector<16x8xf32>, vector<16x8xf32>, vector<16x16xf32> -> vector<16x16xf32>
    %cst_94 = arith.constant -1.000000e+30 : f32
    %140 = vector.broadcast %cst_94 : f32 to vector<16x16xf32>
    %141 = arith.select %38, %139, %140 : vector<16x16xi1>, vector<16x16xf32>
    %cst_95 = arith.constant dense<0xFF800000> : vector<16xf32>
    %142 = vector.multi_reduction <maximumf>, %141, %cst_95 [1] : vector<16x16xf32> to vector<16xf32>
    %143 = vector.shape_cast %142 : vector<16xf32> to vector<16x1xf32>
    %144 = vector.broadcast %143 : vector<16x1xf32> to vector<16x16xf32>
    %145 = arith.subf %141, %144 : vector<16x16xf32>
    %146 = math.exp %145 : vector<16x16xf32>
    %cst_96 = arith.constant dense<0.000000e+00> : vector<16xf32>
    %147 = vector.multi_reduction <add>, %146, %cst_96 [1] : vector<16x16xf32> to vector<16xf32>
    %148 = vector.shape_cast %147 : vector<16xf32> to vector<16x1xf32>
    %149 = tpu.reciprocal %148 : vector<16x1xf32> -> vector<16x1xf32>
    %150 = vector.broadcast %149 : vector<16x1xf32> to vector<16x16xf32>
    %151 = arith.mulf %146, %150 : vector<16x16xf32>
    %cst_97 = arith.constant dense<0.000000e+00> : vector<16x8xf32>
    %152 = tpu.matmul %151, %138, %cst_97 {dimension_numbers = #tpu.dot_dimension_numbers<[1], [0], [0], [1], [0, 0, 1, 1], [], []>} : vector<16x16xf32>, vector<16x8xf32>, vector<16x8xf32> -> vector<16x8xf32>
    %c2_98 = arith.constant 2 : index
    %c0_99 = arith.constant 0 : index
    %c0_100 = arith.constant 0 : index
    %153 = vector.load %arg4[%c2_98, %c0_99, %c0_100] : memref<4x8x32xf32, #tpu.memory_space<vmem>>, vector<1x8x32xf32>
    %154 = vector.shape_cast %153 : vector<1x8x32xf32> to vector<8x32xf32>
    %cst_101 = arith.constant dense<0.000000e+00> : vector<16x32xf32>
    %155 = tpu.matmul %152, %154, %cst_101 {dimension_numbers = #tpu.dot_dimension_numbers<[1], [0], [0], [1], [0, 0, 1, 1], [], []>} : vector<16x8xf32>, vector<8x32xf32>, vector<16x32xf32> -> vector<16x32xf32>
    %156 = arith.addf %117, %155 : vector<16x32xf32>
    %c3_102 = arith.constant 3 : index
    %c0_103 = arith.constant 0 : index
    %c0_104 = arith.constant 0 : index
    %157 = vector.load %arg2[%c3_102, %c0_103, %c0_104] : memref<12x32x8xf32, #tpu.memory_space<vmem>>, vector<1x32x8xf32>
    %158 = vector.shape_cast %157 : vector<1x32x8xf32> to vector<32x8xf32>
    %cst_105 = arith.constant dense<0.000000e+00> : vector<16x8xf32>
    %159 = tpu.matmul %29, %158, %cst_105 {dimension_numbers = #tpu.dot_dimension_numbers<[1], [0], [0], [1], [0, 0, 1, 1], [], []>} : vector<16x32xf32>, vector<32x8xf32>, vector<16x8xf32> -> vector<16x8xf32>
    %c3_106 = arith.constant 3 : index
    %c0_107 = arith.constant 0 : index
    %c0_108 = arith.constant 0 : index
    %160 = vector.load %arg3[%c3_106, %c0_107, %c0_108] : memref<12x1x8xf32, #tpu.memory_space<vmem>>, vector<1x1x8xf32>
    %161 = vector.shape_cast %160 : vector<1x1x8xf32> to vector<1x8xf32>
    %162 = vector.broadcast %161 : vector<1x8xf32> to vector<16x8xf32>
    %163 = arith.addf %159, %162 : vector<16x8xf32>
    %c7 = arith.constant 7 : index
    %c0_109 = arith.constant 0 : index
    %c0_110 = arith.constant 0 : index
    %164 = vector.load %arg2[%c7, %c0_109, %c0_110] : memref<12x32x8xf32, #tpu.memory_space<vmem>>, vector<1x32x8xf32>
    %165 = vector.shape_cast %164 : vector<1x32x8xf32> to vector<32x8xf32>
    %cst_111 = arith.constant dense<0.000000e+00> : vector<16x8xf32>
    %166 = tpu.matmul %29, %165, %cst_111 {dimension_numbers = #tpu.dot_dimension_numbers<[1], [0], [0], [1], [0, 0, 1, 1], [], []>} : vector<16x32xf32>, vector<32x8xf32>, vector<16x8xf32> -> vector<16x8xf32>
    %c7_112 = arith.constant 7 : index
    %c0_113 = arith.constant 0 : index
    %c0_114 = arith.constant 0 : index
    %167 = vector.load %arg3[%c7_112, %c0_113, %c0_114] : memref<12x1x8xf32, #tpu.memory_space<vmem>>, vector<1x1x8xf32>
    %168 = vector.shape_cast %167 : vector<1x1x8xf32> to vector<1x8xf32>
    %169 = vector.broadcast %168 : vector<1x8xf32> to vector<16x8xf32>
    %170 = arith.addf %166, %169 : vector<16x8xf32>
    %c11 = arith.constant 11 : index
    %c0_115 = arith.constant 0 : index
    %c0_116 = arith.constant 0 : index
    %171 = vector.load %arg2[%c11, %c0_115, %c0_116] : memref<12x32x8xf32, #tpu.memory_space<vmem>>, vector<1x32x8xf32>
    %172 = vector.shape_cast %171 : vector<1x32x8xf32> to vector<32x8xf32>
    %cst_117 = arith.constant dense<0.000000e+00> : vector<16x8xf32>
    %173 = tpu.matmul %29, %172, %cst_117 {dimension_numbers = #tpu.dot_dimension_numbers<[1], [0], [0], [1], [0, 0, 1, 1], [], []>} : vector<16x32xf32>, vector<32x8xf32>, vector<16x8xf32> -> vector<16x8xf32>
    %c11_118 = arith.constant 11 : index
    %c0_119 = arith.constant 0 : index
    %c0_120 = arith.constant 0 : index
    %174 = vector.load %arg3[%c11_118, %c0_119, %c0_120] : memref<12x1x8xf32, #tpu.memory_space<vmem>>, vector<1x1x8xf32>
    %175 = vector.shape_cast %174 : vector<1x1x8xf32> to vector<1x8xf32>
    %176 = vector.broadcast %175 : vector<1x8xf32> to vector<16x8xf32>
    %177 = arith.addf %173, %176 : vector<16x8xf32>
    %cst_121 = arith.constant dense<0.000000e+00> : vector<16x16xf32>
    %178 = tpu.matmul %163, %170, %cst_121 {dimension_numbers = #tpu.dot_dimension_numbers<[1], [1], [0], [0], [0, 0, 1, 0], [], []>} : vector<16x8xf32>, vector<16x8xf32>, vector<16x16xf32> -> vector<16x16xf32>
    %cst_122 = arith.constant -1.000000e+30 : f32
    %179 = vector.broadcast %cst_122 : f32 to vector<16x16xf32>
    %180 = arith.select %38, %178, %179 : vector<16x16xi1>, vector<16x16xf32>
    %cst_123 = arith.constant dense<0xFF800000> : vector<16xf32>
    %181 = vector.multi_reduction <maximumf>, %180, %cst_123 [1] : vector<16x16xf32> to vector<16xf32>
    %182 = vector.shape_cast %181 : vector<16xf32> to vector<16x1xf32>
    %183 = vector.broadcast %182 : vector<16x1xf32> to vector<16x16xf32>
    %184 = arith.subf %180, %183 : vector<16x16xf32>
    %185 = math.exp %184 : vector<16x16xf32>
    %cst_124 = arith.constant dense<0.000000e+00> : vector<16xf32>
    %186 = vector.multi_reduction <add>, %185, %cst_124 [1] : vector<16x16xf32> to vector<16xf32>
    %187 = vector.shape_cast %186 : vector<16xf32> to vector<16x1xf32>
    %188 = tpu.reciprocal %187 : vector<16x1xf32> -> vector<16x1xf32>
    %189 = vector.broadcast %188 : vector<16x1xf32> to vector<16x16xf32>
    %190 = arith.mulf %185, %189 : vector<16x16xf32>
    %cst_125 = arith.constant dense<0.000000e+00> : vector<16x8xf32>
    %191 = tpu.matmul %190, %177, %cst_125 {dimension_numbers = #tpu.dot_dimension_numbers<[1], [0], [0], [1], [0, 0, 1, 1], [], []>} : vector<16x16xf32>, vector<16x8xf32>, vector<16x8xf32> -> vector<16x8xf32>
    %c3_126 = arith.constant 3 : index
    %c0_127 = arith.constant 0 : index
    %c0_128 = arith.constant 0 : index
    %192 = vector.load %arg4[%c3_126, %c0_127, %c0_128] : memref<4x8x32xf32, #tpu.memory_space<vmem>>, vector<1x8x32xf32>
    %193 = vector.shape_cast %192 : vector<1x8x32xf32> to vector<8x32xf32>
    %cst_129 = arith.constant dense<0.000000e+00> : vector<16x32xf32>
    %194 = tpu.matmul %191, %193, %cst_129 {dimension_numbers = #tpu.dot_dimension_numbers<[1], [0], [0], [1], [0, 0, 1, 1], [], []>} : vector<16x8xf32>, vector<8x32xf32>, vector<16x32xf32> -> vector<16x32xf32>
    %195 = arith.addf %156, %194 : vector<16x32xf32>
    %196 = arith.addf %7, %195 : vector<16x32xf32>
    %197 = vector.broadcast %4 : vector<1x32xf32> to vector<16x32xf32>
    %198 = arith.addf %196, %197 : vector<16x32xf32>
    %cst_130 = arith.constant dense<0.000000e+00> : vector<16xf32>
    %199 = vector.multi_reduction <add>, %198, %cst_130 [1] : vector<16x32xf32> to vector<16xf32>
    %200 = vector.shape_cast %199 : vector<16xf32> to vector<16x1xf32>
    %cst_131 = arith.constant 3.200000e+01 : f32
    %201 = vector.broadcast %cst_131 : f32 to vector<16x1xf32>
    %202 = arith.divf %200, %201 : vector<16x1xf32>
    %203 = vector.broadcast %202 : vector<16x1xf32> to vector<16x32xf32>
    %204 = arith.subf %198, %203 : vector<16x32xf32>
    %205 = arith.mulf %204, %204 : vector<16x32xf32>
    %cst_132 = arith.constant dense<0.000000e+00> : vector<16xf32>
    %206 = vector.multi_reduction <add>, %205, %cst_132 [1] : vector<16x32xf32> to vector<16xf32>
    %207 = vector.shape_cast %206 : vector<16xf32> to vector<16x1xf32>
    %cst_133 = arith.constant 3.200000e+01 : f32
    %208 = vector.broadcast %cst_133 : f32 to vector<16x1xf32>
    %209 = arith.divf %207, %208 : vector<16x1xf32>
    %210 = vector.broadcast %202 : vector<16x1xf32> to vector<16x32xf32>
    %211 = arith.subf %198, %210 : vector<16x32xf32>
    %cst_134 = arith.constant 9.99999974E-6 : f32
    %212 = vector.broadcast %cst_134 : f32 to vector<16x1xf32>
    %213 = arith.addf %209, %212 : vector<16x1xf32>
    %214 = math.rsqrt %213 : vector<16x1xf32>
    %215 = vector.broadcast %214 : vector<16x1xf32> to vector<16x32xf32>
    %216 = arith.mulf %211, %215 : vector<16x32xf32>
    %217 = vector.broadcast %2 : vector<1x32xf32> to vector<16x32xf32>
    %218 = arith.mulf %216, %217 : vector<16x32xf32>
    %219 = vector.broadcast %3 : vector<1x32xf32> to vector<16x32xf32>
    %220 = arith.addf %218, %219 : vector<16x32xf32>
    %c0_135 = arith.constant 0 : index
    %c0_136 = arith.constant 0 : index
    %221 = vector.load %arg5[%c0_135, %c0_136] : memref<32x128xf32, #tpu.memory_space<vmem>>, vector<32x128xf32>
    %cst_137 = arith.constant dense<0.000000e+00> : vector<16x128xf32>
    %222 = tpu.matmul %220, %221, %cst_137 {dimension_numbers = #tpu.dot_dimension_numbers<[1], [0], [0], [1], [0, 0, 1, 1], [], []>} : vector<16x32xf32>, vector<32x128xf32>, vector<16x128xf32> -> vector<16x128xf32>
    %223 = vector.broadcast %6 : vector<1x128xf32> to vector<16x128xf32>
    %224 = arith.addf %222, %223 : vector<16x128xf32>
    %cst_138 = arith.constant 5.000000e-01 : f32
    %225 = vector.broadcast %cst_138 : f32 to vector<16x128xf32>
    %226 = arith.mulf %225, %224 : vector<16x128xf32>
    %cst_139 = arith.constant 0.707106769 : f32
    %227 = vector.broadcast %cst_139 : f32 to vector<16x128xf32>
    %228 = arith.mulf %224, %227 : vector<16x128xf32>
    %229 = math.erf %228 : vector<16x128xf32>
    %cst_140 = arith.constant 1.000000e+00 : f32
    %230 = vector.broadcast %cst_140 : f32 to vector<16x128xf32>
    %231 = arith.addf %230, %229 : vector<16x128xf32>
    %232 = arith.mulf %226, %231 : vector<16x128xf32>
    %c0_141 = arith.constant 0 : index
    %c0_142 = arith.constant 0 : index
    %233 = vector.load %arg6[%c0_141, %c0_142] : memref<128x32xf32, #tpu.memory_space<vmem>>, vector<128x32xf32>
    %cst_143 = arith.constant dense<0.000000e+00> : vector<16x32xf32>
    %234 = tpu.matmul %232, %233, %cst_143 {dimension_numbers = #tpu.dot_dimension_numbers<[1], [0], [0], [1], [0, 0, 1, 1], [], []>} : vector<16x128xf32>, vector<128x32xf32>, vector<16x32xf32> -> vector<16x32xf32>
    %235 = vector.broadcast %5 : vector<1x32xf32> to vector<16x32xf32>
    %236 = arith.addf %234, %235 : vector<16x32xf32>
    %237 = arith.addf %198, %236 : vector<16x32xf32>
    %c0_144 = arith.constant 0 : index
    %c0_145 = arith.constant 0 : index
    %238 = vector.load %arg7[%c0_144, %c0_145] : memref<16x32xf32, #tpu.memory_space<vmem>>, vector<16x32xf32>
    tpu.vector_store %arg7[%c0_144, %c0_145], %237 {strides = array<i32>} : memref<16x32xf32, #tpu.memory_space<vmem>>, vector<16x32xf32>,
    return
  }
}

</mosaic_0001>

<bundles_post_ra>
// kernel: tpu_custom_call.1
= control target key start
LH: loop header
LB: loop body
LE: loop exit
PB: predicated region body
PF: predicated region fallthrough
CT: control target
= control target key end

     0   :  { %vm36_vm0 = vcmask 261120   ;;  %s3617_s0 = inlined_call_operand.vmem [shape: f32[16,32], index: 0, kind: input, shape index: {}]   ;;  %s3618_s1 = inlined_call_operand.vmem [shape: f32[8,128], index: 1, kind: input, shape index: {}]   ;;  %s3619_s2 = inlined_call_operand.vmem [shape: f32[12,32,8], index: 2, kind: input, shape index: {}]   ;;  %s3620_s3 = inlined_call_operand.vmem [shape: f32[12,1,8], index: 3, kind: input, shape index: {}]   ;;  %s3621_s4 = inlined_call_operand.vmem [shape: f32[4,8,32], index: 4, kind: input, shape index: {}]   ;;  %s3622_s5 = inlined_call_operand.vmem [shape: f32[32,128], index: 5, kind: input, shape index: {}]   ;;  %s3623_s6 = inlined_call_operand.vmem [shape: f32[128,32], index: 6, kind: input, shape index: {}]   ;;  %s3624_s7 = inlined_call_operand.hbm [shape: f32[16,32], index: 7, kind: output, shape index: {}]  }
   0x1   :  { %v3159_v0 = vld [vmem:[%s3617_s0] sm:$0xff]  ;;  %v3164_v1 = vld [vmem:[%s3617_s0 + $0x8] sm:$0xff] }
   0x2   :  { %12 = vsyncpa [#allocation3], 0  ;;  %v37_v2 = vsel %vm36_vm0, %v3159_v0, 0.0  ;;  %v40_v3 = vsel %vm36_vm0, %v3164_v1, 0.0  ;;  %v93_v14 = vld [vmem:[%s3619_s2 + $0x18] sm:$0xff]  ;;  %v92_v15 = vld [vmem:[%s3619_s2 + $0x10] sm:$0xff] }
   0x3   :  { %38 = vadd.xlane.f32.xlu0 %v37_v2  ;;  %2790 = vmatprep.subr.mxu0 %v93_v14  ;;  %v91_v16 = vld [vmem:[%s3619_s2 + $0x8] sm:$0xff]  ;;  %v90_v17 = vld [vmem:[%s3619_s2] sm:$0xff]  ;;  %v2523_v18 = vld [vmem:[%s3619_s2 + $0x98] sm:$0xff]  ;;  %vm358_vm1 = vcmask 64512   ;;  %vm448_vm7 = vcmask 130048   ;;  %s3113_s9 = smov [#allocation2]  }
   0x4   :  { %2791 = vmatpush3.msra.mxu0 %v93_v14  ;;  %v2515_v26 = vld [vmem:[%s3618_s1] ss:$0 sm:$0xff]  ;;  %v2516_v28 = vld [vmem:[%s3618_s1 + $0x1] ss:$0 sm:$0xff]  ;;  %v2522_v35 = vld [vmem:[%s3619_s2 + $0x90] sm:$0xff]  ;;  %s2504_s10 = sshll.u32 %s3113_s9, 4  ;;  %s2505_s10 = int_to_ptr.vmem [resolvable:$true] %s2504_s10 }
   0x5   :  { %2792 = vmatprep.subr.mxu0 %v92_v15  ;;  %v2521_v36 = vld [vmem:[%s3619_s2 + $0x88] sm:$0xff]  ;;  %v2520_v37 = vld [vmem:[%s3619_s2 + $0x80] sm:$0xff]  ;;  %v2531_v38 = vld [vmem:[%s3619_s2 + $0x118] sm:$0xff]  ;;  %s3091_s11 = scalar_lea.vmem %s2505_s10, 256  ;;  %p3096_p1 = scmp.lt.s32.totalorder %s2505_s10, %s2505_s10 }
   0x6   :  { %2793 = vmatpush3.msra.mxu0 %v92_v15  ;;  %v2530_v39 = vld [vmem:[%s3619_s2 + $0x110] sm:$0xff]  ;;  %v2529_v40 = vld [vmem:[%s3619_s2 + $0x108] sm:$0xff]  ;;  %v2528_v41 = vld [vmem:[%s3619_s2 + $0x100] sm:$0xff]  ;;  %p3092_p0 = scmp.ne.s32.totalorder %s2505_s10, %s3091_s11  ;;  %p3097_p2 = scmp.lt.s32.totalorder %s3091_s11, %s3091_s11 }
   0x7   :  { %41 = vadd.xlane.f32.xlu0 %v40_v3  ;;  %2794 = vmatprep.subr.mxu0 %v91_v16  ;;  %v2517_v43 = vld [vmem:[%s3620_s3] ss:$0 sm:$0xff]  ;;  %v2525_v46 = vld [vmem:[%s3620_s3 + $0x4] ss:$0 sm:$0xff]  ;;  %v2533_v51 = vld [vmem:[%s3620_s3 + $0x8] ss:$0 sm:$0xff]  ;;  %v76_v3 = vlaneseq }
   0x8   :  { %2795 = vmatpush3.msra.mxu0 %v91_v16  ;;  %v2545_v52 = vld [vmem:[%s3619_s2 + $0x38] sm:$0xff]  ;;  %v2544_v58 = vld [vmem:[%s3619_s2 + $0x30] sm:$0xff]  ;;  %v2543_v59 = vld [vmem:[%s3619_s2 + $0x28] sm:$0xff]  ;;  %p3098_p3 = por %p3097_p2, %p3096_p1 }
   0x9   :  { %2796 = vmatprep.subr.mxu0 %v90_v17  ;;  %v2542_v60 = vld [vmem:[%s3619_s2 + $0x20] sm:$0xff]  ;;  %v2561_v61 = vld [vmem:[%s3619_s2 + $0x138] sm:$0xff]  ;;  %v2560_v62 = vld [vmem:[%s3619_s2 + $0x130] sm:$0xff] }
   0xa   :  { %2797 = vmatpush3.msra.mxu0 %v90_v17  ;;  %v2559_v63 = vld [vmem:[%s3619_s2 + $0x128] sm:$0xff]  ;;  %v2558_v2 = vld [vmem:[%s3619_s2 + $0x120] sm:$0xff]  ;;  %p3099_p4 = pnand %p3098_p3, %p3092_p0 }
   0xb   :  { %2801 = vmatprep.subr.mxu0 %v2523_v18 }
  0x8c   :  { %v39_v4 = vpop.xlane.xlu0 %38 }
  0x8d   :  { %v44_v5 = vmul.f32 0.03125, %v39_v4  ;;  %v77_v4 = vshrl.u32 %v76_v3, 7 }
  0x8f   :  { %v46_v6 = vsub.f32 %v3159_v0, %v44_v5  ;;  %v78_v5 = vadd.s32 8, %v77_v4 }
  0x90   :  { %v42_v7 = vpop.xlane.xlu0 %41 }
  0x91   :  { %v45_v8 = vmul.f32 0.03125, %v42_v7  ;;  %v48_v9 = vmul.f32 %v46_v6, %v46_v6  ;;  %v82_v7 = vshra.s32 %v78_v5, 3 }
  0x93   :  { %v47_v10 = vsub.f32 %v3164_v1, %v45_v8  ;;  %v50_v11 = vsel %vm36_vm0, %v48_v9, 0.0  ;;  %v81_v9 = vshra.s32 %v77_v4, 3 }
  0x94   :  { %51 = vadd.xlane.f32.xlu1 %v50_v11 }
  0x95   :  { %v49_v12 = vmul.f32 %v47_v10, %v47_v10 }
  0x97   :  { %v53_v13 = vsel %vm36_vm0, %v49_v12, 0.0 }
  0x98   :  { %54 = vadd.xlane.f32.xlu1 %v53_v13 }
 0x11d   :  { %v52_v19 = vpop.xlane.xlu1 %51 }
 0x11e   :  { %v56_v20 = vmul.f32 0.03125, %v52_v19 }
 0x120   :  { %v58_v21 = vadd.f32 1e-05, %v56_v20 }
 0x121   :  { %v55_v22 = vpop.xlane.xlu1 %54 }
 0x122   :  { %3047 = vrsqrt.f32 %v58_v21  ;;  %v57_v23 = vmul.f32 0.03125, %v55_v22 }
 0x124   :  { %v59_v24 = vadd.f32 1e-05, %v57_v23 }
 0x126   :  { %3049 = vrsqrt.f32 %v59_v24 }
 0x12f   :  { %v3048_v25 = vpop.eup %3047 }
 0x130   :  { %v62_v27 = vmul.f32 %v3048_v25, %v46_v6  ;;  %v80_v6 = vand.u32 127, %v76_v3 }
 0x132   :  { %v68_v29 = vmul.f32 %v2515_v26, %v62_v27  ;;  %v83_v8 = vshra.s32 %v80_v6, 3  ;;  %vm87_vm3 = vcmp.ge.s32.totalorder %v78_v5, %v80_v6  ;;  %vm86_vm5 = vcmp.ge.s32.totalorder %v77_v4, %v80_v6 }
 0x133   :  { %v3050_v30 = vpop.eup %3049 }
 0x134   :  { %v3195_v31 = vadd.f32 %v2516_v28, %v68_v29  ;;  %v63_v32 = vmul.f32 %v3050_v30, %v47_v10  ;;  %vm85_vm2 = vcmp.eq.s32.totalorder %v82_v7, %v83_v8  ;;  %vm84_vm4 = vcmp.eq.s32.totalorder %v81_v9, %v83_v8 }
 0x135   :  { %vm3279_vm6 = vmand %vm85_vm2, %vm87_vm3 }
 0x136   :  { %v69_v33 = vmul.f32 %v2515_v26, %v63_v32  ;;  %2798 = vmatprep.mubr.msk.f32.mxu0 %vm36_vm0, %v3195_v31  ;;  %vm3283_vm8 = vmand %vm84_vm4, %vm86_vm5  ;;  %v2553_v32 = vld [vmem:[%s3619_s2 + $0xb8] sm:$0xff] }
 0x138   :  { %v3199_v34 = vadd.f32 %v2516_v28, %v69_v33 }
 0x13a   :  { %2799 = vmatmul.mubr.msk.f32.vlgmr.msra.gmra.mxu0 %vm36_vm0, %v3199_v34 }
 0x13b   :  { %2802 = vmatpush3.msra.mxu0 %v2523_v18  ;;  %2809 = vmatprep.mubr.msk.f32.mxu0 %vm36_vm0, %v3195_v31  ;;  %v2547_v18 = vld [vmem:[%s3620_s3 + $0x1] ss:$0 sm:$0xff] }
 0x13c   :  { %2803 = vmatprep.subr.mxu0 %v2522_v35 }
 0x13d   :  { %2804 = vmatpush3.msra.mxu0 %v2522_v35 }
 0x13e   :  { %2805 = vmatprep.subr.mxu0 %v2521_v36 }
 0x13f   :  { %2806 = vmatpush3.msra.mxu0 %v2521_v36 }
 0x140   :  { %2807 = vmatprep.subr.mxu0 %v2520_v37 }
 0x141   :  { %2808 = vmatpush3.msra.mxu0 %v2520_v37 }
 0x142   :  { %2810 = vmatmul.mubr.msk.f32.vlgmr.msra.gmra.mxu0 %vm36_vm0, %v3199_v34  ;;  %2812 = vmatprep.subr.mxu0 %v2531_v38 }
 0x143   :  { %2813 = vmatpush3.msra.mxu0 %v2531_v38  ;;  %2820 = vmatprep.mubr.msk.f32.mxu0 %vm36_vm0, %v3195_v31 }
 0x144   :  { %2814 = vmatprep.subr.mxu0 %v2530_v39 }
 0x145   :  { %2815 = vmatpush3.msra.mxu0 %v2530_v39 }
 0x146   :  { %2816 = vmatprep.subr.mxu0 %v2529_v40 }
 0x147   :  { %2817 = vmatpush3.msra.mxu0 %v2529_v40  ;;  %v2552_v40 = vld [vmem:[%s3619_s2 + $0xb0] sm:$0xff] }
 0x148   :  { %2818 = vmatprep.subr.mxu0 %v2528_v41 }
 0x149   :  { %2819 = vmatpush3.msra.mxu0 %v2528_v41  ;;  %v2551_v41 = vld [vmem:[%s3619_s2 + $0xa8] sm:$0xff] }
 0x14a   :  { %2821 = vmatmul.mubr.msk.f32.vlgmr.msra.gmra.mxu0 %vm36_vm0, %v3199_v34 }
 0x1fa   :  { %v2800_v42 = vpop.f32.mrf.mxu0 }
 0x1fb   :  { %v179_v54 = vadd.f32 %v2800_v42, %v2517_v43  ;;  %v2550_v42 = vld [vmem:[%s3619_s2 + $0xa0] sm:$0xff] }
 0x1fc   :  { %v173_v44 = vpop.f32.mrf.mxu0 }
 0x1fd   :  { %v174_v45 = vadd.f32 %v2517_v43, %v173_v44 }
 0x1ff   :  { %2827 = vmatprep.mubr.msk.f32.mxu1 %vm358_vm1, %v174_v45  ;;  %v552_v45 = vld [vmem:[%s3621_s4] sm:$0xff] }
 0x202   :  { %v2811_v47 = vpop.f32.mrf.mxu0 }
 0x203   :  { %v267_v48 = vadd.f32 %v2811_v47, %v2525_v46 }
 0x204   :  { %v261_v49 = vpop.f32.mrf.mxu0 }
 0x205   :  { %v262_v50 = vadd.f32 %v2525_v46, %v261_v49  ;;  %2823 = vmatprep.subr.msk.mxu1 %vm358_vm1, %v267_v48  ;;  %v2588_v46 = vld [vmem:[%s3619_s2 + $0xd8] sm:$0xff]  ;;  %v2587_v49 = vld [vmem:[%s3619_s2 + $0xd0] sm:$0xff] }
 0x206   :  { %2824 = vmatpush3.xpose.msk.msra.mxu1 %vm358_vm1, %v267_v48 }
 0x207   :  { %2825 = vmatprep.subr.msk.mxu1 %vm358_vm1, %v262_v50 }
 0x20a   :  { %v2822_v53 = vpop.f32.mrf.mxu0  ;;  %2826 = vmatpush3.xpose.msk.msra.mxu1 %vm358_vm1, %v262_v50  ;;  %v2586_v50 = vld [vmem:[%s3619_s2 + $0xc8] sm:$0xff] }
 0x20b   :  { %v355_v55 = vadd.f32 %v2822_v53, %v2533_v51  ;;  %2837 = vmatprep.subr.mxu1 %v2545_v52 }
 0x20c   :  { %v349_v56 = vpop.f32.mrf.mxu0 }
 0x20d   :  { %v350_v57 = vadd.f32 %v2533_v51, %v349_v56  ;;  %2828 = vmatmul.mubr.msk.f32.vlgmr.msra.gmra.mxu1 %vm358_vm1, %v179_v54  ;;  %2830 = vmatprep.subr.mxu0 %v355_v55  ;;  %v2555_v51 = vld [vmem:[%s3620_s3 + $0x5] ss:$0 sm:$0xff] }
 0x20e   :  { %2831 = vmatpush3.msra.mxu0 %v355_v55  ;;  %2838 = vmatpush3.msra.mxu1 %v2545_v52  ;;  %v2585_v52 = vld [vmem:[%s3619_s2 + $0xc0] sm:$0xff] }
 0x20f   :  { %2845 = vmatprep.mubr.msk.f32.mxu1 %vm36_vm0, %v3195_v31  ;;  %2832 = vmatprep.subr.mxu0 %v350_v57 }
 0x210   :  { %2839 = vmatprep.subr.mxu1 %v2544_v58  ;;  %2833 = vmatpush3.msra.mxu0 %v350_v57 }
 0x211   :  { %2840 = vmatpush3.msra.mxu1 %v2544_v58  ;;  %2848 = vmatprep.subr.mxu0 %v2553_v32  ;;  %v2563_v58 = vld [vmem:[%s3620_s3 + $0x9] ss:$0 sm:$0xff] }
 0x212   :  { %2841 = vmatprep.subr.mxu1 %v2543_v59 }
 0x213   :  { %2842 = vmatpush3.msra.mxu1 %v2543_v59 }
 0x214   :  { %2843 = vmatprep.subr.mxu1 %v2542_v60 }
 0x215   :  { %2844 = vmatpush3.msra.mxu1 %v2542_v60 }
 0x216   :  { %2846 = vmatmul.mubr.msk.f32.vlgmr.msra.gmra.mxu1 %vm36_vm0, %v3199_v34  ;;  %2859 = vmatprep.subr.mxu1 %v2561_v61 }
 0x217   :  { %2860 = vmatpush3.msra.mxu1 %v2561_v61  ;;  %2867 = vmatprep.mubr.msk.f32.mxu1 %vm36_vm0, %v3195_v31 }
 0x218   :  { %2861 = vmatprep.subr.mxu1 %v2560_v62 }
 0x219   :  { %2862 = vmatpush3.msra.mxu1 %v2560_v62 }
 0x21a   :  { %2863 = vmatprep.subr.mxu1 %v2559_v63 }
 0x21b   :  { %2864 = vmatpush3.msra.mxu1 %v2559_v63 }
 0x21c   :  { %2865 = vmatprep.subr.mxu1 %v2558_v2 }
 0x21d   :  { %2866 = vmatpush3.msra.mxu1 %v2558_v2  ;;  %v2590_v2 = vld [vmem:[%s3620_s3 + $0x6] ss:$0 sm:$0xff] }
 0x21e   :  { %2868 = vmatmul.mubr.msk.f32.vlgmr.msra.gmra.mxu1 %vm36_vm0, %v3199_v34  ;;  %2889 = vmatprep.subr.mxu1 %v552_v45 }
 0x21f   :  { %2890 = vmatpush3.msra.mxu1 %v552_v45 }
 0x220   :  { %2905 = vmatprep.subr.mxu1 %v2588_v46 }
 0x2cd   :  { %v2829_v11 = vpop.f32.mrf.mxu1 }
 0x2ce   :  { %v447_v13 = vsel %vm3279_vm6, %v2829_v11, -1e+30 }
 0x2cf   :  { %v437_v14 = vpop.f32.mrf.mxu1  ;;  %v452_v15 = vsel %vm448_vm7, %v447_v13, -inf }
 0x2d0   :  { %v446_v16 = vsel %vm3283_vm8, %v437_v14, -1e+30  ;;  %453 = vmax.xlane.f32.xlu1 %v452_v15 }
 0x2d1   :  { %v449_v17 = vsel %vm448_vm7, %v446_v16, -inf }
 0x2d2   :  { %450 = vmax.xlane.f32.xlu0 %v449_v17 }
 0x2d6   :  { %v2847_v19 = vpop.f32.mrf.mxu1 }
 0x2d7   :  { %v3296_v20 = vadd.f32 %v2847_v19, %v2547_v18 }
 0x2d8   :  { %v632_v43 = vpop.f32.mrf.mxu1 }
 0x2d9   :  { %v633_v44 = vadd.f32 %v2547_v18, %v632_v43  ;;  %v2593_v43 = vld [vmem:[%s3619_s2 + $0x140] sm:$0xff] }
 0x2de   :  { %v2869_v57 = vpop.f32.mrf.mxu1 }
 0x2df   :  { %v814_v59 = vadd.f32 %v2869_v57, %v2563_v58 }
 0x2e0   :  { %v808_v60 = vpop.f32.mrf.mxu1 }
 0x2e1   :  { %v809_v61 = vadd.f32 %v2563_v58, %v808_v60 }
 0x359   :  { %v454_v21 = vpop.xlane.xlu1 %453 }
 0x35a   :  { %v456_v22 = vsub.f32 %v447_v13, %v454_v21 }
 0x35b   :  { %v451_v23 = vpop.xlane.xlu0 %450 }
 0x35c   :  { %v459_v24 = vmul.f32 1.442695, %v456_v22  ;;  %v455_v25 = vsub.f32 %v446_v16, %v451_v23 }
 0x35e   :  { %3051 = vpow2.f32 %v459_v24  ;;  %v457_v26 = vmul.f32 1.442695, %v455_v25  ;;  %v2572_v25 = vld [vmem:[%s3621_s4 + $0x8] sm:$0xff] }
 0x360   :  { %3053 = vpow2.f32 %v457_v26 }
 0x36b   :  { %v3052_v27 = vpop.eup %3051 }
 0x36c   :  { %v464_v28 = vsel %vm448_vm7, %v3052_v27, 0.0 }
 0x36d   :  { %v3054_v29 = vpop.eup %3053  ;;  %465 = vadd.xlane.f32.xlu1 %v464_v28 }
 0x36e   :  { %v461_v30 = vsel %vm448_vm7, %v3054_v29, 0.0 }
 0x36f   :  { %462 = vadd.xlane.f32.xlu0 %v461_v30 }
 0x3f6   :  { %v466_v33 = vpop.xlane.xlu1 %465 }
 0x3f7   :  { %3055 = vrcp.f32 %v466_v33  ;;  %v2580_v33 = vld [vmem:[%s3619_s2 + $0x58] sm:$0xff] }
 0x3f8   :  { %v463_v35 = vpop.xlane.xlu0 %462 }
 0x3f9   :  { %3057 = vrcp.f32 %v463_v35 }
 0x404   :  { %v3056_v36 = vpop.eup %3055 }
 0x405   :  { %v470_v39 = vmul.f32 %v3056_v36, %v3052_v27 }
 0x406   :  { %v3058_v37 = vpop.eup %3057 }
 0x407   :  { %v469_v38 = vmul.f32 %v3058_v37, %v3054_v29  ;;  %v2579_v37 = vld [vmem:[%s3619_s2 + $0x50] sm:$0xff] }
 0x409   :  { %2834 = vmatprep.mubr.msk.f32.mxu0 %vm448_vm7, %v469_v38  ;;  %v2578_v38 = vld [vmem:[%s3619_s2 + $0x48] sm:$0xff] }
 0x40a   :  { %2835 = vmatmul.mubr.msk.f32.vlgmr.msra.gmra.mxu0 %vm448_vm7, %v470_v39  ;;  %v2577_v39 = vld [vmem:[%s3619_s2 + $0x40] sm:$0xff] }
 0x40b   :  { %2849 = vmatpush3.msra.mxu0 %v2553_v32  ;;  %2856 = vmatprep.mubr.msk.f32.mxu0 %vm36_vm0, %v3195_v31 }
 0x40c   :  { %2850 = vmatprep.subr.mxu0 %v2552_v40 }
 0x40d   :  { %2851 = vmatpush3.msra.mxu0 %v2552_v40  ;;  %v2596_v40 = vld [vmem:[%s3619_s2 + $0x158] sm:$0xff] }
 0x40e   :  { %2852 = vmatprep.subr.mxu0 %v2551_v41 }
 0x40f   :  { %2853 = vmatpush3.msra.mxu0 %v2551_v41  ;;  %v2595_v41 = vld [vmem:[%s3619_s2 + $0x150] sm:$0xff] }
 0x410   :  { %2854 = vmatprep.subr.mxu0 %v2550_v42 }
 0x411   :  { %2855 = vmatpush3.msra.mxu0 %v2550_v42  ;;  %v2594_v42 = vld [vmem:[%s3619_s2 + $0x148] sm:$0xff] }
 0x412   :  { %2857 = vmatmul.mubr.msk.f32.vlgmr.msra.gmra.mxu0 %vm36_vm0, %v3199_v34 }
 0x413   :  { %2874 = vmatprep.mubr.msk.f32.mxu0 %vm358_vm1, %v633_v44 }
 0x4ca   :  { %v2836_v47 = vpop.f32.mrf.mxu0 }
 0x4cc   :  { %v543_v48 = vpop.f32.mrf.mxu0 }
 0x4cd   :  { %2891 = vmatprep.mubr.msk.f32.mxu1 %vm358_vm1, %v543_v48 }
 0x4ce   :  { %2892 = vmatmul.mubr.msk.f32.vlgmr.msra.gmra.mxu1 %vm358_vm1, %v2836_v47  ;;  %v2582_v47 = vld [vmem:[%s3620_s3 + $0x2] ss:$0 sm:$0xff] }
 0x4cf   :  { %2906 = vmatpush3.msra.mxu1 %v2588_v46  ;;  %2913 = vmatprep.mubr.msk.f32.mxu1 %vm36_vm0, %v3195_v31 }
 0x4d0   :  { %2907 = vmatprep.subr.mxu1 %v2587_v49 }
 0x4d1   :  { %2908 = vmatpush3.msra.mxu1 %v2587_v49 }
 0x4d2   :  { %v2858_v53 = vpop.f32.mrf.mxu0  ;;  %2909 = vmatprep.subr.mxu1 %v2586_v50 }
 0x4d3   :  { %v726_v54 = vadd.f32 %v2858_v53, %v2555_v51  ;;  %2910 = vmatpush3.msra.mxu1 %v2586_v50 }
 0x4d4   :  { %v720_v55 = vpop.f32.mrf.mxu0  ;;  %2911 = vmatprep.subr.mxu1 %v2585_v52 }
 0x4d5   :  { %v721_v56 = vadd.f32 %v2555_v51, %v720_v55  ;;  %2870 = vmatprep.subr.msk.mxu0 %vm358_vm1, %v726_v54  ;;  %2912 = vmatpush3.msra.mxu1 %v2585_v52  ;;  %v2598_v51 = vld [vmem:[%s3620_s3 + $0xa] ss:$0 sm:$0xff] }
 0x4d6   :  { %2871 = vmatpush3.xpose.msk.msra.mxu0 %vm358_vm1, %v726_v54  ;;  %2914 = vmatmul.mubr.msk.f32.vlgmr.msra.gmra.mxu1 %vm36_vm0, %v3199_v34 }
 0x4d7   :  { %2872 = vmatprep.subr.msk.mxu0 %vm358_vm1, %v721_v56 }
 0x4da   :  { %2873 = vmatpush3.xpose.msk.msra.mxu0 %vm358_vm1, %v721_v56 }
 0x4db   :  { %2877 = vmatprep.subr.mxu0 %v814_v59 }
 0x4dd   :  { %2875 = vmatmul.mubr.msk.f32.vlgmr.msra.gmra.mxu0 %vm358_vm1, %v3296_v20 }
 0x4de   :  { %2878 = vmatpush3.msra.mxu0 %v814_v59 }
 0x4df   :  { %2879 = vmatprep.subr.mxu0 %v809_v61 }
 0x4e0   :  { %2880 = vmatpush3.msra.mxu0 %v809_v61 }
 0x4e1   :  { %2884 = vmatprep.subr.mxu0 %v2572_v25 }
 0x58e   :  { %v3352_v62 = vpop.f32.mrf.mxu1 }
 0x590   :  { %v3354_v63 = vpop.f32.mrf.mxu1 }
 0x596   :  { %v2915_v3 = vpop.f32.mrf.mxu1 }
 0x597   :  { %v1346_v4 = vadd.f32 %v2915_v3, %v2590_v2 }
 0x598   :  { %v1340_v5 = vpop.f32.mrf.mxu1 }
 0x599   :  { %v1341_v6 = vadd.f32 %v2590_v2, %v1340_v5  ;;  %2927 = vmatprep.subr.msk.mxu1 %vm358_vm1, %v1346_v4 }
 0x59a   :  { %2928 = vmatpush3.xpose.msk.msra.mxu1 %vm358_vm1, %v1346_v4 }
 0x59b   :  { %2929 = vmatprep.subr.msk.mxu1 %vm358_vm1, %v1341_v6 }
 0x59d   :  { %v2876_v7 = vpop.f32.mrf.mxu0 }
 0x59e   :  { %v905_v8 = vsel %vm3279_vm6, %v2876_v7, -1e+30  ;;  %2930 = vmatpush3.xpose.msk.msra.mxu1 %vm358_vm1, %v1341_v6 }
 0x59f   :  { %v895_v9 = vpop.f32.mrf.mxu0  ;;  %v909_v11 = vsel %vm448_vm7, %v905_v8, -inf }
 0x5a0   :  { %v904_v13 = vsel %vm3283_vm8, %v895_v9, -1e+30  ;;  %910 = vmax.xlane.f32.xlu1 %v909_v11 }
 0x5a1   :  { %v906_v14 = vsel %vm448_vm7, %v904_v13, -inf }
 0x5a2   :  { %907 = vmax.xlane.f32.xlu0 %v906_v14  ;;  %v2613_v14 = vld [vmem:[%s3619_s2 + $0x78] sm:$0xff] }
 0x629   :  { %v911_v15 = vpop.xlane.xlu1 %910 }
 0x62a   :  { %v913_v16 = vsub.f32 %v905_v8, %v911_v15  ;;  %v2607_v15 = vld [vmem:[%s3621_s4 + $0x10] sm:$0xff] }
 0x62b   :  { %v908_v17 = vpop.xlane.xlu0 %907  ;;  %2941 = vmatprep.subr.mxu1 %v2607_v15 }
 0x62c   :  { %v916_v18 = vmul.f32 1.442695, %v913_v16  ;;  %v912_v19 = vsub.f32 %v904_v13, %v908_v17 }
 0x62e   :  { %3059 = vpow2.f32 %v916_v18  ;;  %v914_v20 = vmul.f32 1.442695, %v912_v19 }
 0x630   :  { %3061 = vpow2.f32 %v914_v20 }
 0x63b   :  { %v3060_v21 = vpop.eup %3059 }
 0x63c   :  { %v921_v22 = vsel %vm448_vm7, %v3060_v21, 0.0 }
 0x63d   :  { %v3062_v23 = vpop.eup %3061  ;;  %922 = vadd.xlane.f32.xlu1 %v921_v22  ;;  %v2612_v22 = vld [vmem:[%s3619_s2 + $0x70] sm:$0xff] }
 0x63e   :  { %v918_v24 = vsel %vm448_vm7, %v3062_v23, 0.0 }
 0x63f   :  { %919 = vadd.xlane.f32.xlu0 %v918_v24  ;;  %v2610_v24 = vld [vmem:[%s3619_s2 + $0x60] sm:$0xff] }
 0x6c6   :  { %v923_v26 = vpop.xlane.xlu1 %922 }
 0x6c7   :  { %3063 = vrcp.f32 %v923_v26  ;;  %v2628_v26 = vld [vmem:[%s3619_s2 + $0x170] sm:$0xff] }
 0x6c8   :  { %v920_v27 = vpop.xlane.xlu0 %919 }
 0x6c9   :  { %3065 = vrcp.f32 %v920_v27  ;;  %v2627_v27 = vld [vmem:[%s3619_s2 + $0x168] sm:$0xff] }
 0x6d4   :  { %v3064_v28 = vpop.eup %3063 }
 0x6d5   :  { %v927_v32 = vmul.f32 %v3064_v28, %v3060_v21  ;;  %v2626_v28 = vld [vmem:[%s3619_s2 + $0x160] sm:$0xff] }
 0x6d6   :  { %v3066_v29 = vpop.eup %3065 }
 0x6d7   :  { %v926_v30 = vmul.f32 %v3066_v29, %v3062_v23  ;;  %v2611_v23 = vld [vmem:[%s3619_s2 + $0x68] sm:$0xff]  ;;  %v2621_v29 = vld [vmem:[%s3619_s2 + $0xf8] sm:$0xff] }
 0x6d9   :  { %2881 = vmatprep.mubr.msk.f32.mxu0 %vm448_vm7, %v926_v30 }
 0x6da   :  { %2882 = vmatmul.mubr.msk.f32.vlgmr.msra.gmra.mxu0 %vm448_vm7, %v927_v32 }
 0x6db   :  { %2885 = vmatpush3.msra.mxu0 %v2572_v25  ;;  %v2629_v25 = vld [vmem:[%s3619_s2 + $0x178] sm:$0xff] }
 0x6dc   :  { %2894 = vmatprep.subr.mxu0 %v2580_v33 }
 0x79a   :  { %v2883_v35 = vpop.f32.mrf.mxu0 }
 0x79c   :  { %v1000_v36 = vpop.f32.mrf.mxu0 }
 0x79d   :  { %2886 = vmatprep.mubr.msk.f32.mxu0 %vm358_vm1, %v1000_v36  ;;  %v2615_v36 = vld [vmem:[%s3620_s3 + $0x3] ss:$0 sm:$0xff] }
 0x79e   :  { %2887 = vmatmul.mubr.msk.f32.vlgmr.msra.gmra.mxu0 %vm358_vm1, %v2883_v35  ;;  %v2619_v35 = vld [vmem:[%s3619_s2 + $0xe8] sm:$0xff] }
 0x79f   :  { %2895 = vmatpush3.msra.mxu0 %v2580_v33  ;;  %2902 = vmatprep.mubr.msk.f32.mxu0 %vm36_vm0, %v3195_v31  ;;  %v2620_v33 = vld [vmem:[%s3619_s2 + $0xf0] sm:$0xff] }
 0x7a0   :  { %2896 = vmatprep.subr.mxu0 %v2579_v37 }
 0x7a1   :  { %2897 = vmatpush3.msra.mxu0 %v2579_v37  ;;  %v2618_v37 = vld [vmem:[%s3619_s2 + $0xe0] sm:$0xff] }
 0x7a2   :  { %2898 = vmatprep.subr.mxu0 %v2578_v38 }
 0x7a3   :  { %2899 = vmatpush3.msra.mxu0 %v2578_v38 }
 0x7a4   :  { %2900 = vmatprep.subr.mxu0 %v2577_v39 }
 0x7a5   :  { %2901 = vmatpush3.msra.mxu0 %v2577_v39 }
 0x7a6   :  { %2903 = vmatmul.mubr.msk.f32.vlgmr.msra.gmra.mxu0 %vm36_vm0, %v3199_v34  ;;  %2916 = vmatprep.subr.mxu0 %v2596_v40 }
 0x7a7   :  { %2917 = vmatpush3.msra.mxu0 %v2596_v40  ;;  %2924 = vmatprep.mubr.msk.f32.mxu0 %vm36_vm0, %v3195_v31 }
 0x7a8   :  { %2918 = vmatprep.subr.mxu0 %v2595_v41 }
 0x7a9   :  { %2919 = vmatpush3.msra.mxu0 %v2595_v41  ;;  %v2631_v41 = vld [vmem:[%s3620_s3 + $0xb] ss:$0 sm:$0xff] }
 0x7aa   :  { %2920 = vmatprep.subr.mxu0 %v2594_v42 }
 0x7ab   :  { %2921 = vmatpush3.msra.mxu0 %v2594_v42 }
 0x7ac   :  { %2922 = vmatprep.subr.mxu0 %v2593_v43 }
 0x7ad   :  { %2923 = vmatpush3.msra.mxu0 %v2593_v43 }
 0x7ae   :  { %2925 = vmatmul.mubr.msk.f32.vlgmr.msra.gmra.mxu0 %vm36_vm0, %v3199_v34 }
 0x85e   :  { %v3410_v44 = vpop.f32.mrf.mxu0 }
 0x860   :  { %v3412_v45 = vpop.f32.mrf.mxu0 }
 0x866   :  { %v2904_v46 = vpop.f32.mrf.mxu0 }
 0x867   :  { %v1258_v50 = vadd.f32 %v2904_v46, %v2582_v47 }
 0x868   :  { %v1252_v48 = vpop.f32.mrf.mxu0 }
 0x869   :  { %v1253_v49 = vadd.f32 %v2582_v47, %v1252_v48  ;;  %v1170_v48 = vadd.f32 %v3352_v62, %v3410_v44 }
 0x86b   :  { %2931 = vmatprep.mubr.msk.f32.mxu1 %vm358_vm1, %v1253_v49 }
 0x86c   :  { %2932 = vmatmul.mubr.msk.f32.vlgmr.msra.gmra.mxu1 %vm358_vm1, %v1258_v50 }
 0x86d   :  { %2942 = vmatpush3.msra.mxu1 %v2607_v15 }
 0x86e   :  { %v2926_v52 = vpop.f32.mrf.mxu0  ;;  %2957 = vmatprep.subr.mxu1 %v2621_v29 }
 0x86f   :  { %v1434_v53 = vadd.f32 %v2926_v52, %v2598_v51 }
 0x870   :  { %v1428_v54 = vpop.f32.mrf.mxu0 }
 0x871   :  { %v1429_v55 = vadd.f32 %v2598_v51, %v1428_v54  ;;  %2934 = vmatprep.subr.mxu0 %v1434_v53 }
 0x872   :  { %2935 = vmatpush3.msra.mxu0 %v1434_v53  ;;  %v2623_v53 = vld [vmem:[%s3620_s3 + $0x7] ss:$0 sm:$0xff] }
 0x873   :  { %2936 = vmatprep.subr.mxu0 %v1429_v55 }
 0x874   :  { %2937 = vmatpush3.msra.mxu0 %v1429_v55 }
 0x875   :  { %2946 = vmatprep.subr.mxu0 %v2613_v14 }
 0x92c   :  { %v2933_v56 = vpop.f32.mrf.mxu1 }
 0x92d   :  { %v1525_v57 = vsel %vm3279_vm6, %v2933_v56, -1e+30 }
 0x92e   :  { %v1515_v58 = vpop.f32.mrf.mxu1  ;;  %v1529_v59 = vsel %vm448_vm7, %v1525_v57, -inf }
 0x92f   :  { %v1524_v60 = vsel %vm3283_vm8, %v1515_v58, -1e+30  ;;  %1530 = vmax.xlane.f32.xlu1 %v1529_v59 }
 0x930   :  { %v1526_v61 = vsel %vm448_vm7, %v1524_v60, -inf }
 0x931   :  { %1527 = vmax.xlane.f32.xlu0 %v1526_v61 }
 0x9b8   :  { %v1531_v2 = vpop.xlane.xlu1 %1530 }
 0x9b9   :  { %v1533_v3 = vsub.f32 %v1525_v57, %v1531_v2 }
 0x9ba   :  { %v1528_v4 = vpop.xlane.xlu0 %1527 }
 0x9bb   :  { %v1536_v5 = vmul.f32 1.442695, %v1533_v3  ;;  %v1532_v6 = vsub.f32 %v1524_v60, %v1528_v4 }
 0x9bd   :  { %3067 = vpow2.f32 %v1536_v5  ;;  %v1534_v7 = vmul.f32 1.442695, %v1532_v6 }
 0x9bf   :  { %3069 = vpow2.f32 %v1534_v7 }
 0x9ca   :  { %v3068_v8 = vpop.eup %3067 }
 0x9cb   :  { %v1541_v9 = vsel %vm448_vm7, %v3068_v8, 0.0 }
 0x9cc   :  { %v3070_v11 = vpop.eup %3069  ;;  %1542 = vadd.xlane.f32.xlu1 %v1541_v9 }
 0x9cd   :  { %v1538_v13 = vsel %vm448_vm7, %v3070_v11, 0.0 }
 0x9ce   :  { %1539 = vadd.xlane.f32.xlu0 %v1538_v13 }
 0xa55   :  { %v1543_v16 = vpop.xlane.xlu1 %1542 }
 0xa56   :  { %3071 = vrcp.f32 %v1543_v16 }
 0xa57   :  { %v1540_v17 = vpop.xlane.xlu0 %1539 }
 0xa58   :  { %3073 = vrcp.f32 %v1540_v17 }
 0xa63   :  { %v3072_v18 = vpop.eup %3071 }
 0xa64   :  { %v1547_v21 = vmul.f32 %v3072_v18, %v3068_v8  ;;  %v2640_v8 = vld [vmem:[%s3621_s4 + $0x18] sm:$0xff] }
 0xa65   :  { %v3074_v19 = vpop.eup %3073 }
 0xa66   :  { %v1546_v20 = vmul.f32 %v3074_v19, %v3070_v11 }
 0xa68   :  { %2938 = vmatprep.mubr.msk.f32.mxu0 %vm448_vm7, %v1546_v20 }
 0xa69   :  { %2939 = vmatmul.mubr.msk.f32.vlgmr.msra.gmra.mxu0 %vm448_vm7, %v1547_v21  ;;  %v2643_v21 = vld [vmem:[%s3618_s1 + $0x4] ss:$0 sm:$0xff] }
 0xa6a   :  { %2947 = vmatpush3.msra.mxu0 %v2613_v14  ;;  %2954 = vmatprep.mubr.msk.f32.mxu0 %vm36_vm0, %v3195_v31 }
 0xa6b   :  { %2948 = vmatprep.subr.mxu0 %v2612_v22 }
 0xa6c   :  { %2949 = vmatpush3.msra.mxu0 %v2612_v22 }
 0xa6d   :  { %2950 = vmatprep.subr.mxu0 %v2611_v23 }
 0xa6e   :  { %2951 = vmatpush3.msra.mxu0 %v2611_v23 }
 0xa6f   :  { %2952 = vmatprep.subr.mxu0 %v2610_v24 }
 0xa70   :  { %2953 = vmatpush3.msra.mxu0 %v2610_v24 }
 0xa71   :  { %2955 = vmatmul.mubr.msk.f32.vlgmr.msra.gmra.mxu0 %vm36_vm0, %v3199_v34  ;;  %2968 = vmatprep.subr.mxu0 %v2629_v25 }
 0xa72   :  { %2969 = vmatpush3.msra.mxu0 %v2629_v25  ;;  %2976 = vmatprep.mubr.msk.f32.mxu0 %vm36_vm0, %v3195_v31 }
 0xa73   :  { %2970 = vmatprep.subr.mxu0 %v2628_v26 }
 0xa74   :  { %2971 = vmatpush3.msra.mxu0 %v2628_v26 }
 0xa75   :  { %2972 = vmatprep.subr.mxu0 %v2627_v27 }
 0xa76   :  { %2973 = vmatpush3.msra.mxu0 %v2627_v27 }
 0xa77   :  { %2974 = vmatprep.subr.mxu0 %v2626_v28 }
 0xa78   :  { %2975 = vmatpush3.msra.mxu0 %v2626_v28 }
 0xa79   :  { %2977 = vmatmul.mubr.msk.f32.vlgmr.msra.gmra.mxu0 %vm36_vm0, %v3199_v34 }
 0xb29   :  { %v2940_v30 = vpop.f32.mrf.mxu0 }
 0xb2b   :  { %v1620_v32 = vpop.f32.mrf.mxu0 }
 0xb2c   :  { %2943 = vmatprep.mubr.msk.f32.mxu1 %vm358_vm1, %v1620_v32 }
 0xb2d   :  { %2944 = vmatmul.mubr.msk.f32.vlgmr.msra.gmra.mxu1 %vm358_vm1, %v2940_v30 }
 0xb2e   :  { %2958 = vmatpush3.msra.mxu1 %v2621_v29  ;;  %2965 = vmatprep.mubr.msk.f32.mxu1 %vm36_vm0, %v3195_v31 }
 0xb2f   :  { %2959 = vmatprep.subr.mxu1 %v2620_v33 }
 0xb30   :  { %2960 = vmatpush3.msra.mxu1 %v2620_v33 }
 0xb31   :  { %v2956_v38 = vpop.f32.mrf.mxu0  ;;  %2961 = vmatprep.subr.mxu1 %v2619_v35 }
 0xb32   :  { %v1799_v39 = vadd.f32 %v2956_v38, %v2615_v36  ;;  %2962 = vmatpush3.msra.mxu1 %v2619_v35 }
 0xb33   :  { %v1793_v40 = vpop.f32.mrf.mxu0  ;;  %2963 = vmatprep.subr.mxu1 %v2618_v37 }
 0xb34   :  { %v1794_v31 = vadd.f32 %v2615_v36, %v1793_v40  ;;  %2964 = vmatpush3.msra.mxu1 %v2618_v37  ;;  %v2304_v40 = vld [vmem:[%s3622_s5 + $0x18] sm:$0xff] }
 0xb35   :  { %2966 = vmatmul.mubr.msk.f32.vlgmr.msra.gmra.mxu1 %vm36_vm0, %v3199_v34  ;;  %v1165_v34 = vadd.f32 %v3354_v63, %v3412_v45 }
 0xb36   :  { %2983 = vmatprep.mubr.msk.f32.mxu1 %vm358_vm1, %v1794_v31  ;;  %v2303_v31 = vld [vmem:[%s3622_s5 + $0x10] sm:$0xff] }
 0xb39   :  { %v2978_v42 = vpop.f32.mrf.mxu0 }
 0xb3a   :  { %v1975_v43 = vadd.f32 %v2978_v42, %v2631_v41  ;;  %v2301_v42 = vld [vmem:[%s3622_s5] sm:$0xff] }
 0xb3b   :  { %v1969_v46 = vpop.f32.mrf.mxu0 }
 0xb3c   :  { %v1970_v47 = vadd.f32 %v2631_v41, %v1969_v46  ;;  %2986 = vmatprep.subr.mxu0 %v1975_v43  ;;  %v2302_v41 = vld [vmem:[%s3622_s5 + $0x8] sm:$0xff]  ;;  %v2414_v46 = vld [vmem:[%s3623_s6 + $0x70] sm:$0xff] }
 0xb3d   :  { %2987 = vmatpush3.msra.mxu0 %v1975_v43  ;;  %v2415_v43 = vld [vmem:[%s3623_s6 + $0x78] sm:$0xff] }
 0xb3e   :  { %2988 = vmatprep.subr.mxu0 %v1970_v47 }
 0xb3f   :  { %2989 = vmatpush3.msra.mxu0 %v1970_v47  ;;  %v2413_v47 = vld [vmem:[%s3623_s6 + $0x68] sm:$0xff] }
 0xb40   :  { %2998 = vmatprep.subr.mxu0 %v2304_v40 }
 0xbed   :  { %v2945_v49 = vpop.f32.mrf.mxu1 }
 0xbee   :  { %v1713_v50 = vadd.f32 %v2945_v49, %v1170_v48 }
 0xbef   :  { %v1703_v51 = vpop.f32.mrf.mxu1 }
 0xbf0   :  { %v1712_v52 = vadd.f32 %v1703_v51, %v1165_v34 }
 0xbf5   :  { %v2967_v54 = vpop.f32.mrf.mxu1 }
 0xbf6   :  { %v1887_v55 = vadd.f32 %v2967_v54, %v2623_v53  ;;  %v2644_v54 = vld [vmem:[%s3618_s1 + $0x2] ss:$0 sm:$0xff] }
 0xbf7   :  { %v1881_v56 = vpop.f32.mrf.mxu1 }
 0xbf8   :  { %v1882_v57 = vadd.f32 %v2623_v53, %v1881_v56  ;;  %2979 = vmatprep.subr.msk.mxu1 %vm358_vm1, %v1887_v55 }
 0xbf9   :  { %2980 = vmatpush3.xpose.msk.msra.mxu1 %vm358_vm1, %v1887_v55 }
 0xbfa   :  { %2981 = vmatprep.subr.msk.mxu1 %vm358_vm1, %v1882_v57 }
 0xbfd   :  { %2982 = vmatpush3.xpose.msk.msra.mxu1 %vm358_vm1, %v1882_v57 }
 0xbfe   :  { %2993 = vmatprep.subr.mxu1 %v2640_v8 }
 0xc00   :  { %2984 = vmatmul.mubr.msk.f32.vlgmr.msra.gmra.mxu1 %vm358_vm1, %v1799_v39 }
 0xc01   :  { %2994 = vmatpush3.msra.mxu1 %v2640_v8  ;;  %v2401_v8 = vld [vmem:[%s3623_s6 + $0x8] sm:$0xff] }
 0xc02   :  { %3009 = vmatprep.subr.mxu1 %v2415_v43 }
 0xcc0   :  { %v2985_v62 = vpop.f32.mrf.mxu1 }
 0xcc1   :  { %v2066_v63 = vsel %vm3279_vm6, %v2985_v62, -1e+30 }
 0xcc2   :  { %v2056_v44 = vpop.f32.mrf.mxu1  ;;  %v2070_v45 = vsel %vm448_vm7, %v2066_v63, -inf }
 0xcc3   :  { %v2065_v58 = vsel %vm3283_vm8, %v2056_v44, -1e+30  ;;  %2071 = vmax.xlane.f32.xlu1 %v2070_v45 }
 0xcc4   :  { %v2067_v59 = vsel %vm448_vm7, %v2065_v58, -inf }
 0xcc5   :  { %2068 = vmax.xlane.f32.xlu0 %v2067_v59  ;;  %v2412_v59 = vld [vmem:[%s3623_s6 + $0x60] sm:$0xff] }
 0xd4c   :  { %v2072_v60 = vpop.xlane.xlu1 %2071 }
 0xd4d   :  { %v2074_v61 = vsub.f32 %v2066_v63, %v2072_v60  ;;  %v2645_v63 = vld [vmem:[%s3618_s1 + $0x3] ss:$0 sm:$0xff]  ;;  %v2411_v60 = vld [vmem:[%s3623_s6 + $0x58] sm:$0xff] }
 0xd4e   :  { %v2069_v2 = vpop.xlane.xlu0 %2068 }
 0xd4f   :  { %v2077_v3 = vmul.f32 1.442695, %v2074_v61  ;;  %v2073_v4 = vsub.f32 %v2065_v58, %v2069_v2  ;;  %v2410_v61 = vld [vmem:[%s3623_s6 + $0x50] sm:$0xff]  ;;  %v2409_v2 = vld [vmem:[%s3623_s6 + $0x48] sm:$0xff] }
 0xd51   :  { %3075 = vpow2.f32 %v2077_v3  ;;  %v2075_v5 = vmul.f32 1.442695, %v2073_v4  ;;  %v2408_v3 = vld [vmem:[%s3623_s6 + $0x40] sm:$0xff]  ;;  %v2407_v4 = vld [vmem:[%s3623_s6 + $0x38] sm:$0xff] }
 0xd53   :  { %3077 = vpow2.f32 %v2075_v5  ;;  %v2406_v5 = vld [vmem:[%s3623_s6 + $0x30] sm:$0xff] }
 0xd5e   :  { %v3076_v10 = vpop.eup %3075 }
 0xd5f   :  { %v2082_v6 = vsel %vm448_vm7, %v3076_v10, 0.0 }
 0xd60   :  { %v3078_v7 = vpop.eup %3077  ;;  %2083 = vadd.xlane.f32.xlu1 %v2082_v6  ;;  %v2404_v6 = vld [vmem:[%s3623_s6 + $0x20] sm:$0xff] }
 0xd61   :  { %v2079_v12 = vsel %vm448_vm7, %v3078_v7, 0.0 }
 0xd62   :  { %2080 = vadd.xlane.f32.xlu0 %v2079_v12  ;;  %v2402_v12 = vld [vmem:[%s3623_s6 + $0x10] sm:$0xff] }
 0xde9   :  { %v2084_v9 = vpop.xlane.xlu1 %2083 }
 0xdea   :  { %3079 = vrcp.f32 %v2084_v9  ;;  %v2400_v9 = vld [vmem:[%s3623_s6] sm:$0xff] }
 0xdeb   :  { %v2081_v11 = vpop.xlane.xlu0 %2080 }
 0xdec   :  { %3081 = vrcp.f32 %v2081_v11  ;;  %v2646_v11 = vld [vmem:[%s3618_s1 + $0x6] ss:$0 sm:$0xff] }
 0xdf7   :  { %v3080_v13 = vpop.eup %3079 }
 0xdf8   :  { %v2088_v16 = vmul.f32 %v3080_v13, %v3076_v10  ;;  %v2405_v10 = vld [vmem:[%s3623_s6 + $0x28] sm:$0xff] }
 0xdf9   :  { %v3082_v14 = vpop.eup %3081 }
 0xdfa   :  { %v2087_v15 = vmul.f32 %v3082_v14, %v3078_v7  ;;  %v2403_v7 = vld [vmem:[%s3623_s6 + $0x18] sm:$0xff] }
 0xdfc   :  { %2990 = vmatprep.mubr.msk.f32.mxu0 %vm448_vm7, %v2087_v15 }
 0xdfd   :  { %2991 = vmatmul.mubr.msk.f32.vlgmr.msra.gmra.mxu0 %vm448_vm7, %v2088_v16 }
 0xdfe   :  { %2999 = vmatpush3.msra.mxu0 %v2304_v40 }
 0xdff   :  { %3000 = vmatprep.subr.mxu0 %v2303_v31 }
 0xe00   :  { %3001 = vmatpush3.msra.mxu0 %v2303_v31 }
 0xe01   :  { %3002 = vmatprep.subr.mxu0 %v2302_v41 }
 0xe02   :  { %3003 = vmatpush3.msra.mxu0 %v2302_v41 }
 0xe03   :  { %3004 = vmatprep.subr.mxu0 %v2301_v42 }
 0xe04   :  { %3005 = vmatpush3.msra.mxu0 %v2301_v42 }
 0xebd   :  { %v2992_v17 = vpop.f32.mrf.mxu0 }
 0xebf   :  { %v2161_v18 = vpop.f32.mrf.mxu0 }
 0xec0   :  { %2995 = vmatprep.mubr.msk.f32.mxu1 %vm358_vm1, %v2161_v18 }
 0xec1   :  { %2996 = vmatmul.mubr.msk.f32.vlgmr.msra.gmra.mxu1 %vm358_vm1, %v2992_v17 }
 0xec2   :  { %3010 = vmatpush3.msra.mxu1 %v2415_v43 }
 0xec3   :  { %3011 = vmatprep.subr.mxu1 %v2414_v46 }
 0xec4   :  { %3012 = vmatpush3.msra.mxu1 %v2414_v46 }
 0xec5   :  { %3013 = vmatprep.subr.mxu1 %v2413_v47 }
 0xec6   :  { %3014 = vmatpush3.msra.mxu1 %v2413_v47 }
 0xec7   :  { %3015 = vmatprep.subr.mxu1 %v2412_v59 }
 0xec8   :  { %3016 = vmatpush3.msra.mxu1 %v2412_v59 }
 0xec9   :  { %3017 = vmatprep.subr.mxu1 %v2411_v60 }
 0xeca   :  { %3018 = vmatpush3.msra.mxu1 %v2411_v60 }
 0xecb   :  { %3019 = vmatprep.subr.mxu1 %v2410_v61 }
 0xecc   :  { %3020 = vmatpush3.msra.mxu1 %v2410_v61 }
 0xecd   :  { %3021 = vmatprep.subr.mxu1 %v2409_v2 }
 0xece   :  { %3022 = vmatpush3.msra.mxu1 %v2409_v2 }
 0xecf   :  { %3023 = vmatprep.subr.mxu1 %v2408_v3 }
 0xed0   :  { %3024 = vmatpush3.msra.mxu1 %v2408_v3 }
 0xed1   :  { %3025 = vmatprep.subr.mxu1 %v2407_v4 }
 0xed2   :  { %3026 = vmatpush3.msra.mxu1 %v2407_v4 }
 0xed3   :  { %3027 = vmatprep.subr.mxu1 %v2406_v5 }
 0xed4   :  { %3028 = vmatpush3.msra.mxu1 %v2406_v5 }
 0xed5   :  { %3029 = vmatprep.subr.mxu1 %v2405_v10 }
 0xed6   :  { %3030 = vmatpush3.msra.mxu1 %v2405_v10 }
 0xed7   :  { %3031 = vmatprep.subr.mxu1 %v2404_v6 }
 0xed8   :  { %3032 = vmatpush3.msra.mxu1 %v2404_v6 }
 0xed9   :  { %3033 = vmatprep.subr.mxu1 %v2403_v7 }
 0xeda   :  { %3034 = vmatpush3.msra.mxu1 %v2403_v7 }
 0xedb   :  { %3035 = vmatprep.subr.mxu1 %v2402_v12 }
 0xedc   :  { %3036 = vmatpush3.msra.mxu1 %v2402_v12 }
 0xedd   :  { %3037 = vmatprep.subr.mxu1 %v2401_v8 }
 0xede   :  { %3038 = vmatpush3.msra.mxu1 %v2401_v8 }
 0xedf   :  { %3039 = vmatprep.subr.mxu1 %v2400_v9 }
 0xee0   :  { %3040 = vmatpush3.msra.mxu1 %v2400_v9 }
 0xf81   :  { %v2997_v19 = vpop.f32.mrf.mxu1 }
 0xf82   :  { %v2254_v20 = vadd.f32 %v2997_v19, %v1713_v50 }
 0xf83   :  { %v2244_v22 = vpop.f32.mrf.mxu1 }
 0xf84   :  { %v2256_v23 = vadd.f32 %v2254_v20, %v3164_v1  ;;  %v2253_v24 = vadd.f32 %v2244_v22, %v1712_v52 }
 0xf86   :  { %v3523_v25 = vadd.f32 %v2643_v21, %v2256_v23  ;;  %v2255_v26 = vadd.f32 %v2253_v24, %v3159_v0 }
 0xf88   :  { %v3526_v27 = vadd.f32 %v2643_v21, %v2255_v26  ;;  %v2266_v28 = vsel %vm36_vm0, %v3523_v25, 0.0 }
 0xf89   :  { %2267 = vadd.xlane.f32.xlu1 %v2266_v28 }
 0xf8a   :  { %v2263_v29 = vsel %vm36_vm0, %v3526_v27, 0.0 }
 0xf8b   :  { %2264 = vadd.xlane.f32.xlu0 %v2263_v29  ;;  %v2649_v29 = vld [vmem:[%s3618_s1 + $0x5] ss:$0 sm:$0xff] }
0x1012   :  { %v2268_v30 = vpop.xlane.xlu1 %2267 }
0x1013   :  { %v2270_v32 = vmul.f32 0.03125, %v2268_v30 }
0x1014   :  { %v2265_v33 = vpop.xlane.xlu0 %2264 }
0x1015   :  { %v2272_v1 = vsub.f32 %v3523_v25, %v2270_v32  ;;  %v2269_v35 = vmul.f32 0.03125, %v2265_v33 }
0x1017   :  { %v2271_v36 = vsub.f32 %v3526_v27, %v2269_v35  ;;  %v2274_v37 = vmul.f32 %v2272_v1, %v2272_v1 }
0x1019   :  { %v2278_v0 = vsel %vm36_vm0, %v2274_v37, 0.0  ;;  %v2273_v38 = vmul.f32 %v2271_v36, %v2271_v36 }
0x101a   :  { %2279 = vadd.xlane.f32.xlu1 %v2278_v0 }
0x101b   :  { %v2275_v39 = vsel %vm36_vm0, %v2273_v38, 0.0 }
0x101c   :  { %2276 = vadd.xlane.f32.xlu0 %v2275_v39 }
0x10a3   :  { %v2280_v48 = vpop.xlane.xlu1 %2279 }
0x10a4   :  { %v2282_v49 = vmul.f32 0.03125, %v2280_v48 }
0x10a5   :  { %v2277_v34 = vpop.xlane.xlu0 %2276 }
0x10a6   :  { %v2284_v50 = vadd.f32 1e-05, %v2282_v49  ;;  %v2281_v51 = vmul.f32 0.03125, %v2277_v34 }
0x10a8   :  { %3083 = vrsqrt.f32 %v2284_v50  ;;  %v2283_v52 = vadd.f32 1e-05, %v2281_v51 }
0x10aa   :  { %3085 = vrsqrt.f32 %v2283_v52 }
0x10b5   :  { %v3084_v53 = vpop.eup %3083 }
0x10b6   :  { %v2288_v55 = vmul.f32 %v3084_v53, %v2272_v1 }
0x10b7   :  { %v3086_v56 = vpop.eup %3085 }
0x10b8   :  { %v2287_v57 = vmul.f32 %v3086_v56, %v2271_v36  ;;  %v2294_v62 = vmul.f32 %v2644_v54, %v2288_v55 }
0x10ba   :  { %v2293_v44 = vmul.f32 %v2644_v54, %v2287_v57  ;;  %v2300_v58 = vadd.f32 %v2645_v63, %v2294_v62 }
0x10bc   :  { %v2299_v45 = vadd.f32 %v2645_v63, %v2293_v44 }
0x10be   :  { %3006 = vmatprep.mubr.msk.f32.mxu0 %vm36_vm0, %v2299_v45 }
0x10bf   :  { %3007 = vmatmul.mubr.msk.f32.vlgmr.msra.gmra.mxu0 %vm36_vm0, %v2300_v58 }
0x117f   :  { %v3008_v13 = vpop.f32.mrf.mxu0 }
0x1180   :  { %v2387_v14 = vadd.f32 %v3008_v13, %v2646_v11 }
0x1181   :  { %v2381_v15 = vpop.f32.mrf.mxu0 }
0x1182   :  { %v2393_v16 = vmul.f32 0.70710677, %v2387_v14  ;;  %v2382_v17 = vadd.f32 %v2646_v11, %v2381_v15  ;;  %v2391_v24 = vmul.f32 0.5, %v2387_v14 }
0x1184   :  { %3087 = verf.f32 %v2393_v16  ;;  %v2392_v18 = vmul.f32 0.70710677, %v2382_v17  ;;  %v2390_v22 = vmul.f32 0.5, %v2382_v17 }
0x1186   :  { %3089 = verf.f32 %v2392_v18 }
0x1191   :  { %v3088_v19 = vpop.eup %3087 }
0x1192   :  { %v2397_v21 = vadd.f32 1.0, %v3088_v19 }
0x1193   :  { %v3090_v20 = vpop.eup %3089 }
0x1194   :  { %v2396_v23 = vadd.f32 1.0, %v3090_v20  ;;  %v2399_v28 = vmul.f32 %v2397_v21, %v2391_v24 }
0x1196   :  { %v2398_v26 = vmul.f32 %v2396_v23, %v2390_v22 }
0x1198   :  { %3041 = vmatprep.mubr.f32.mxu1 %v2398_v26 }
0x1199   :  { %3042 = vmatmul.mubr.f32.vlgmr.msra.gmra.mxu1 %v2399_v28 }
0x1259   :  { %v3043_v30 = vpop.f32.mrf.mxu1 }
0x125a   :  { %v2492_v32 = vadd.f32 %v3043_v30, %v2649_v29 }
0x125b   :  { %v2486_v33 = vpop.f32.mrf.mxu1 }
0x125c   :  { %v2496_v1 = vadd.f32 %v2492_v32, %v3523_v25  ;;  %v2487_v35 = vadd.f32 %v2649_v29, %v2486_v33 }
0x125e   :  { %2498 = vst.msk [vmem:[#allocation2 + $0x8] sm:$0xff] %vm36_vm0, %v2496_v1  ;;  %v2495_v36 = vadd.f32 %v2487_v35, %v3526_v27 }
0x1260   :  { %2497 = vst.msk [vmem:[#allocation2] sm:$0xff] %vm36_vm0, %v2495_v36 }
0x1261   :  { %3102 = shalt.err (!%p3099_p4)
}
0x1262   :  { %s3114_s1 = smov 128   ;;  %s3115_s2 = smov 8  }
0x1263   :  { %2510 = dma.vmem_to_hbm [thread:$0]  %s2505_s10, 256, %s3624_s7, [#allocation3], %s3114_s1, %s3114_s1, %s3115_s2  }
0x1264   :  { %3111 = dma.done.wait [#allocation3], 256  }
0x1265   :  { %3112 = vsyncadd [#allocation3], 4294967040 }
0x1266   :  { %2514 = vsyncpa [#allocation3], 1 }

</bundles_post_ra>
